<compile_context>
chip_gen: v6e
topology: v6e:2x2x1
jax: 0.10.0
libtpu: 0.0.40
codegen_flags: <defaults>
</compile_context>

<pallas_src>
import functools

import jax
import jax.numpy as jnp
from jax.experimental import pallas as pl
from jax.experimental.pallas import tpu as pltpu


def _round_up(x, m):
    return (x + m - 1) // m * m


@functools.lru_cache(maxsize=None)
def _tpu_generation():
    """Best-effort TPU generation; used only for tile-size / megacore tweaks."""
    try:
        kind = jax.devices()[0].device_kind.lower()
    except Exception:
        return 6
    for gen, tags in ((7, ("v7", "7x")), (6, ("v6", "6e")),
                      (5, ("v5",)), (4, ("v4",))):
        if any(t in kind for t in tags):
            return gen
    return 6


# ----------------------------------------------------------------------------
# Pallas kernel factory: (sum of matmuls) + folded-BN + LeakyReLU(0.1) + skip
# ----------------------------------------------------------------------------
def _make_conv_kernel(num_src, k_tiled, has_skip):
    """Kernel refs: a_0..a_{S-1}, b_0..b_{S-1}, scale, bias, [skip], out, [acc]."""

    def kernel(*refs):
        if k_tiled:
            acc_ref = refs[-1]
            refs = refs[:-1]
        o_ref = refs[-1]
        ins = refs[:-1]
        a_refs = ins[:num_src]
        b_refs = ins[num_src:2 * num_src]
        s_ref = ins[2 * num_src]
        c_ref = ins[2 * num_src + 1]
        skip_ref = ins[2 * num_src + 2] if has_skip else None

        def matmul_sum():
            acc = jnp.dot(a_refs[0][...], b_refs[0][...],
                          preferred_element_type=jnp.float32)
            for a_r, b_r in zip(a_refs[1:], b_refs[1:]):
                acc += jnp.dot(a_r[...], b_r[...],
                               preferred_element_type=jnp.float32)
            return acc

        def epilogue(acc):
            y = acc * s_ref[...] + c_ref[...]
            y = jnp.where(y >= 0.0, y, 0.1 * y)          # LeakyReLU(0.1)
            if skip_ref is not None:                      # fused residual add
                y = y + skip_ref[...].astype(jnp.float32)
            o_ref[...] = y.astype(o_ref.dtype)

        if not k_tiled:
            epilogue(matmul_sum())
        else:
            @pl.when(pl.program_id(2) == 0)
            def _init():
                acc_ref[...] = jnp.zeros_like(acc_ref)

            acc_ref[...] += matmul_sum()

            @pl.when(pl.program_id(2) == pl.num_programs(2) - 1)
            def _fini():
                epilogue(acc_ref[...])

    return kernel


_TK_CAP = 2304  # K-tile cap; max K in this network is 4608 -> at most 2 steps


def _choose_tk(K, cap=_TK_CAP):
    """Largest K tile <= cap that is a multiple of 128 and divides K."""
    if K <= cap or K % 128 != 0:
        return K
    best = 128
    for cand in range(128, cap + 1, 128):
        if K % cand == 0:
            best = cand
    return best


def _fused_matmul_bn_lrelu(a_list, b_list, scale, bias, skip=None):
    """out = leaky_relu(sum_i a_i @ b_i * scale + bias, 0.1) [+ skip].

    a_i: (M, K_i) bf16, b_i: (K_i, Cp) bf16, scale/bias: (1, Cp) f32,
    skip: (M, Cp) bf16 or None.  Cp is a multiple of 128.  Returns (M, Cp) bf16.
    """
    num_src = len(a_list)
    M = a_list[0].shape[0]
    Cp = b_list[0].shape[1]
    assert Cp % 128 == 0
    gen = _tpu_generation()

    # Robustness: if the single source has a huge, non-128-divisible K, pad it
    # up with zeros so it can be tiled (never triggers for this network).
    if num_src == 1 and a_list[0].shape[1] > _TK_CAP and a_list[0].shape[1] % 128:
        kpad = _round_up(a_list[0].shape[1], 128) - a_list[0].shape[1]
        a_list = [jnp.pad(a_list[0], ((0, 0), (0, kpad)))]
        b_list = [jnp.pad(b_list[0], ((0, kpad), (0, 0)))]

    Ks = [a.shape[1] for a in a_list]
    k_total = sum(Ks)

    # Tile sizes: big M tiles on every generation (double-buffered working set
    # stays well under VMEM with the explicit limit below), lane-dense N tiles.
    tn = 256 if Cp % 256 == 0 else 128
    tm = min(M, 1024)
    grid_m = pl.cdiv(M, tm)
    grid_n = Cp // tn

    # v7x has 2 TensorCores sharded over "parallel" axes: guarantee >= 2 blocks.
    if gen >= 7 and grid_m * grid_n == 1:
        if M >= 16:
            tm = _round_up(pl.cdiv(M, 2), 8)
            grid_m = pl.cdiv(M, tm)
        elif tn > 128:
            tn = 128
            grid_n = Cp // tn

    flops = 2 * M * k_total * Cp
    bytes_accessed = (sum(a.size * a.dtype.itemsize for a in a_list)
                      + sum(b.size * b.dtype.itemsize for b in b_list)
                      + (skip.size * skip.dtype.itemsize if skip is not None else 0)
                      + scale.size * 4 + bias.size * 4 + M * Cp * 2)
    cost = pl.CostEstimate(flops=flops, transcendentals=0,
                           bytes_accessed=bytes_accessed)

    # Scoped-VMEM headroom for the larger tiles (v7x only has 64 MiB physical).
    vmem_limit = (40 if gen >= 7 else 64) * 1024 * 1024
    out_shape = jax.ShapeDtypeStruct((M, Cp), jnp.bfloat16)

    tk = _choose_tk(Ks[0]) if num_src == 1 else Ks[0]
    k_tiled = (num_src == 1 and tk != Ks[0])
    kernel = _make_conv_kernel(num_src, k_tiled, skip is not None)

    if not k_tiled:
        in_specs = [pl.BlockSpec((tm, k_i), lambda i, j: (i, 0)) for k_i in Ks]
        in_specs += [pl.BlockSpec((k_i, tn), lambda i, j: (0, j)) for k_i in Ks]
        in_specs += [pl.BlockSpec((1, tn), lambda i, j: (0, j)),
                     pl.BlockSpec((1, tn), lambda i, j: (0, j))]
        args = list(a_list) + list(b_list) + [scale, bias]
        if skip is not None:
            in_specs.append(pl.BlockSpec((tm, tn), lambda i, j: (i, j)))
            args.append(skip)
        return pl.pallas_call(
            kernel,
            out_shape=out_shape,
            grid=(grid_m, grid_n),
            in_specs=in_specs,
            out_specs=pl.BlockSpec((tm, tn), lambda i, j: (i, j)),
            compiler_params=pltpu.CompilerParams(
                dimension_semantics=("parallel", "parallel"),
                vmem_limit_bytes=vmem_limit),
            cost_estimate=cost,
        )(*args)

    kt = Ks[0] // tk
    in_specs = [pl.BlockSpec((tm, tk), lambda i, j, k: (i, k)),
                pl.BlockSpec((tk, tn), lambda i, j, k: (k, j)),
                pl.BlockSpec((1, tn), lambda i, j, k: (0, j)),
                pl.BlockSpec((1, tn), lambda i, j, k: (0, j))]
    args = [a_list[0], b_list[0], scale, bias]
    if skip is not None:
        in_specs.append(pl.BlockSpec((tm, tn), lambda i, j, k: (i, j)))
        args.append(skip)
    return pl.pallas_call(
        kernel,
        out_shape=out_shape,
        grid=(grid_m, grid_n, kt),
        in_specs=in_specs,
        out_specs=pl.BlockSpec((tm, tn), lambda i, j, k: (i, j)),
        scratch_shapes=[pltpu.VMEM((tm, tn), jnp.float32)],
        compiler_params=pltpu.CompilerParams(
            dimension_semantics=("parallel", "parallel", "arbitrary"),
            vmem_limit_bytes=vmem_limit),
        cost_estimate=cost,
    )(*args)


# ----------------------------------------------------------------------------
# BaseConv = Conv2d(bias=False) + BatchNorm (folded) + LeakyReLU(0.1) [+ skip]
# ----------------------------------------------------------------------------
@functools.partial(jax.jit, static_argnames=("stride",))
def conv_bn_lrelu(x, w, scale, bias, skip=None, *, stride=1):
    """x: (N,H,W,Cx) NHWC bf16 (Cx may exceed the true cin due to padding),
    w: (KH,KW,Cin_w,Cp) HWIO bf16 (Cp padded to a multiple of 128),
    scale/bias: (Cp,) f32, skip: optional (N,Ho,Wo,Cp) residual added after act.
    """
    N, H, W, Cx = x.shape
    KH, KW, Cin_w, Cp = w.shape
    pad = (KH - 1) // 2
    Ho = (H + 2 * pad - KH) // stride + 1
    Wo = (W + 2 * pad - KW) // stride + 1
    M = N * Ho * Wo

    x = x.astype(jnp.bfloat16)
    if KH == 1 and KW == 1 and stride == 1:
        # 1x1 convs consume the full (zero-)padded channel width directly.
        assert Cin_w == Cx
        a = x.reshape(M, Cx)
    else:
        # TODO(synk): im2col patches still materialized in HBM; an in-kernel
        # per-tap accumulation with halo DMAs would remove this 9x traffic.
        xsl = x if Cx == Cin_w else jax.lax.slice_in_dim(x, 0, Cin_w, axis=3)
        xp = jnp.pad(xsl, ((0, 0), (pad, pad), (pad, pad), (0, 0)))
        cols = []
        for kh in range(KH):
            for kw in range(KW):
                cols.append(
                    jax.lax.slice(
                        xp,
                        (0, kh, kw, 0),
                        (N, kh + stride * (Ho - 1) + 1,
                         kw + stride * (Wo - 1) + 1, Cin_w),
                        (1, stride, stride, 1),
                    )
                )
        a = jnp.concatenate(cols, axis=-1).reshape(M, KH * KW * Cin_w)

    w2 = w.reshape(KH * KW * Cin_w, Cp).astype(jnp.bfloat16)
    skip2 = None if skip is None else skip.astype(jnp.bfloat16).reshape(M, Cp)
    out = _fused_matmul_bn_lrelu(
        [a], [w2],
        scale.reshape(1, Cp).astype(jnp.float32),
        bias.reshape(1, Cp).astype(jnp.float32),
        skip=skip2,
    )
    return out.reshape(N, Ho, Wo, Cp)


@jax.jit
def conv1x1_multi_bn_lrelu(xs, w, scale, bias):
    """1x1 conv over the *virtual* channel-concat of `xs` (never materialized).

    xs: list of NHWC bf16 tensors with identical N,H,W; sum of channels equals
    w.shape[2].  The weight is split along K and each source is a separate MXU
    operand accumulated inside one Pallas kernel.
    """
    N, H, W, _ = xs[0].shape
    M = N * H * W
    Cp = w.shape[-1]
    wf = w.reshape(w.shape[2], Cp).astype(jnp.bfloat16)
    a_list, b_list, off = [], [], 0
    for src in xs:
        c = src.shape[-1]
        a_list.append(src.astype(jnp.bfloat16).reshape(M, c))
        b_list.append(jax.lax.slice_in_dim(wf, off, off + c, axis=0))
        off += c
    out = _fused_matmul_bn_lrelu(
        a_list, b_list,
        scale.reshape(1, Cp).astype(jnp.float32),
        bias.reshape(1, Cp).astype(jnp.float32),
    )
    return out.reshape(N, H, W, Cp)


def _maxpool_same(x, ks):
    pad = ks // 2
    neg_inf = jnp.array(-jnp.inf, dtype=x.dtype)
    return jax.lax.reduce_window(
        x, neg_inf, jax.lax.max,
        (1, ks, ks, 1), (1, 1, 1, 1),
        ((0, 0), (pad, pad), (pad, pad), (0, 0)),
    )


def _upsample2x(x):  # nearest, scale_factor=2
    return jnp.repeat(jnp.repeat(x, 2, axis=1), 2, axis=2)


# ----------------------------------------------------------------------------
# Deterministic parameter construction (synthetic weights, BN folded, padded)
# ----------------------------------------------------------------------------
class _Keys:
    def __init__(self, key):
        self._key = key

    def __call__(self):
        self._key, sub = jax.random.split(self._key)
        return sub


def _init_conv(key, cin, cout, ks, stride):
    kw_, kg, kb = jax.random.split(key, 3)
    fan_in = ks * ks * cin
    w = jax.random.normal(kw_, (ks, ks, cin, cout), jnp.float32) * (2.0 / fan_in) ** 0.5
    gamma = 1.0 + 0.05 * jax.random.normal(kg, (cout,), jnp.float32)
    beta = 0.05 * jax.random.normal(kb, (cout,), jnp.float32)
    running_mean = jnp.zeros((cout,), jnp.float32)
    running_var = jnp.ones((cout,), jnp.float32)
    eps = 1e-3  # BaseConv's BatchNorm2d eps
    scale = gamma / jnp.sqrt(running_var + eps)
    bias = beta - running_mean * scale

    # Pad Cout to a multiple of 128 ONCE here (lane-dense stores, no slices);
    # padded channels get scale=bias=0 so they carry exact zeros downstream.
    cout_p = _round_up(cout, 128)
    # 1x1 convs read the producer's padded activation directly -> pad Cin too;
    # k>1 convs slice the true channels inside the im2col gather instead.
    cin_p = _round_up(cin, 128) if ks == 1 else cin
    w = jnp.pad(w, ((0, 0), (0, 0), (0, cin_p - cin), (0, cout_p - cout)))
    scale = jnp.pad(scale, (0, cout_p - cout))
    bias = jnp.pad(bias, (0, cout_p - cout))
    return {"w": w.astype(jnp.bfloat16), "scale": scale, "bias": bias,
            "stride": stride}


def _group_layer(kg, cin, num_blocks, stride):
    blocks = [("conv", _init_conv(kg(), cin, cin * 2, 3, stride))]
    for _ in range(num_blocks):  # ResLayer(cin*2)
        blocks.append(("res", (_init_conv(kg(), cin * 2, cin, 1, 1),
                               _init_conv(kg(), cin, cin * 2, 3, 1))))
    return blocks


def _spp_block(kg, filters_list, in_filters):
    f0, f1 = filters_list
    hidden = f1 // 2
    return [
        ("conv", _init_conv(kg(), in_filters, f0, 1, 1)),
        ("conv", _init_conv(kg(), f0, f1, 3, 1)),
        ("spp", (_init_conv(kg(), f1, hidden, 1, 1),
                 _init_conv(kg(), hidden * 4, f0, 1, 1))),
        ("conv", _init_conv(kg(), f0, f1, 3, 1)),
        ("conv", _init_conv(kg(), f1, f0, 1, 1)),
    ]


def _embedding(kg, filters_list, in_filters):
    f0, f1 = filters_list
    return [
        ("conv", _init_conv(kg(), in_filters, f0, 1, 1)),
        ("conv", _init_conv(kg(), f0, f1, 3, 1)),
        ("conv", _init_conv(kg(), f1, f0, 1, 1)),
        ("conv", _init_conv(kg(), f0, f1, 3, 1)),
        ("conv", _init_conv(kg(), f1, f0, 1, 1)),
    ]


def init_yolofpn_params(key):
    kg = _Keys(key)
    params = {}
    # Darknet-53 backbone: blocks per stage = [2, 8, 8, 4]
    stem = [("conv", _init_conv(kg(), 3, 32, 3, 1))] + _group_layer(kg, 32, 1, 2)
    dark2 = _group_layer(kg, 64, 2, 2)
    dark3 = _group_layer(kg, 128, 8, 2)
    dark4 = _group_layer(kg, 256, 8, 2)
    dark5 = _group_layer(kg, 512, 4, 2) + _spp_block(kg, [512, 1024], 1024)
    params["backbone"] = {"stem": stem, "dark2": dark2, "dark3": dark3,
                          "dark4": dark4, "dark5": dark5}
    # FPN neck
    params["out1_cbl"] = _init_conv(kg(), 512, 256, 1, 1)
    params["out1"] = _embedding(kg, [256, 512], 512 + 256)
    params["out2_cbl"] = _init_conv(kg(), 256, 128, 1, 1)
    params["out2"] = _embedding(kg, [128, 256], 256 + 128)
    return params


# ----------------------------------------------------------------------------
# Forward pass
# ----------------------------------------------------------------------------
def _base_conv(p, x, skip=None):
    return conv_bn_lrelu(x, p["w"], p["scale"], p["bias"], skip,
                         stride=p["stride"])


def _multi_conv(p, xs):
    return conv1x1_multi_bn_lrelu(xs, p["w"], p["scale"], p["bias"])


def _apply_block(block, x):
    kind, pb = block
    if kind == "conv":
        return _base_conv(pb, x)
    if kind == "res":
        c1, c2 = pb
        # Residual add fused into the 3x3 conv epilogue (no extra HBM round trip).
        return _base_conv(c2, _base_conv(c1, x), skip=x)
    if kind == "spp":
        c1, c2 = pb
        y = _base_conv(c1, x)
        pools = [_maxpool_same(y, ks) for ks in (5, 9, 13)]
        # 1x1 conv over the virtual 2048-ch concat (never materialized).
        return _multi_conv(c2, [y] + pools)
    raise ValueError(kind)


def _apply_seq(blocks, x):
    for b in blocks:
        x = _apply_block(b, x)
    return x


def _apply_embedding(blocks, xs):
    # First 1x1 conv consumes the virtual concat of the FPN lateral sources.
    _, p0 = blocks[0]
    x = _multi_conv(p0, xs)
    for b in blocks[1:]:
        x = _apply_block(b, x)
    return x


def yolofpn_forward(params, x_nchw):
    """Input NCHW image; returns (out_dark3, out_dark4, x0) in NCHW (f32)."""
    x = jnp.transpose(x_nchw, (0, 2, 3, 1)).astype(jnp.bfloat16)  # -> NHWC bf16

    bb = params["backbone"]
    x = _apply_seq(bb["stem"], x)
    x = _apply_seq(bb["dark2"], x)
    d3 = _apply_seq(bb["dark3"], x)     # 256 ch, /8
    d4 = _apply_seq(bb["dark4"], d3)    # 512 ch, /16
    d5 = _apply_seq(bb["dark5"], d4)    # 512 ch, /32

    x2, x1, x0 = d3, d4, d5

    x1_in = _upsample2x(_base_conv(params["out1_cbl"], x0))   # 256 ch
    out_dark4 = _apply_embedding(params["out1"], [x1_in, x1])  # cat(256,512)->256

    x2_in = _upsample2x(_base_conv(params["out2_cbl"], out_dark4))  # 128 ch
    out_dark3 = _apply_embedding(params["out2"], [x2_in, x2])  # cat(128,256)->128

    to_nchw = lambda t: jnp.transpose(t, (0, 3, 1, 2)).astype(jnp.float32)
    return to_nchw(out_dark3), to_nchw(out_dark4), to_nchw(x0)


# ----------------------------------------------------------------------------
if __name__ == "__main__":
    key = jax.random.PRNGKey(0)
    pkey, xkey = jax.random.split(key)

    params = init_yolofpn_params(pkey)
    # Small image consistent with Darknet-53's /32 total stride.
    x = jax.random.normal(xkey, (2, 3, 64, 64), jnp.float32)

    out_dark3, out_dark4, x0 = yolofpn_forward(params, x)
    out_dark3, out_dark4, x0 = jax.block_until_ready((out_dark3, out_dark4, x0))

    assert out_dark3.shape == (2, 128, 8, 8), out_dark3.shape
    assert out_dark4.shape == (2, 256, 4, 4), out_dark4.shape
    assert x0.shape == (2, 512, 2, 2), x0.shape
    assert bool(jnp.all(jnp.isfinite(out_dark3)))
    assert bool(jnp.all(jnp.isfinite(out_dark4)))
    assert bool(jnp.all(jnp.isfinite(x0)))

    print("KERNEL_OK")
</pallas_src>

<mosaic_0001>
module attributes {stable_mosaic.version = 11 : i64} {
  func.func @kernel(%arg0: i32, %arg1: i32, %arg2: memref<1024x27xbf16, #tpu.memory_space<vmem>>, %arg3: memref<27x128xbf16, #tpu.memory_space<vmem>>, %arg4: memref<1x128xf32, #tpu.memory_space<vmem>>, %arg5: memref<1x128xf32, #tpu.memory_space<vmem>>, %arg6: memref<1024x128xbf16, #tpu.memory_space<vmem>>) attributes {dimension_semantics = [#tpu.dimension_semantics<parallel>, #tpu.dimension_semantics<parallel>], iteration_bounds = array<i64: 8, 1>, scalar_prefetch = 0 : i64, scratch_operands = 0 : i64, tpu.core_type = #tpu.core_type<tc>, window_params = [{transform_indices = @transform_0, window_bounds = array<i64: 1024, 27>}, {transform_indices = @transform_1, window_bounds = array<i64: 27, 128>}, {transform_indices = @transform_2, window_bounds = array<i64: 1, 128>}, {transform_indices = @transform_3, window_bounds = array<i64: 1, 128>}, {transform_indices = @transform_4, window_bounds = array<i64: 1024, 128>}]} {
    %c0 = arith.constant 0 : index
    %c0_0 = arith.constant 0 : index
    %0 = vector.load %arg2[%c0, %c0_0] : memref<1024x27xbf16, #tpu.memory_space<vmem>>, vector<1024x27xbf16>
    %c0_1 = arith.constant 0 : index
    %c0_2 = arith.constant 0 : index
    %1 = vector.load %arg3[%c0_1, %c0_2] : memref<27x128xbf16, #tpu.memory_space<vmem>>, vector<27x128xbf16>
    %cst = arith.constant dense<0.000000e+00> : vector<1024x128xf32>
    %2 = tpu.matmul %0, %1, %cst {dimension_numbers = #tpu.dot_dimension_numbers<[1], [0], [0], [1], [0, 0, 1, 1], [], []>} : vector<1024x27xbf16>, vector<27x128xbf16>, vector<1024x128xf32> -> vector<1024x128xf32>
    %c0_3 = arith.constant 0 : index
    %c0_4 = arith.constant 0 : index
    %3 = vector.load %arg4[%c0_3, %c0_4] : memref<1x128xf32, #tpu.memory_space<vmem>>, vector<1x128xf32>
    %4 = vector.broadcast %3 : vector<1x128xf32> to vector<1024x128xf32>
    %5 = arith.mulf %2, %4 : vector<1024x128xf32>
    %c0_5 = arith.constant 0 : index
    %c0_6 = arith.constant 0 : index
    %6 = vector.load %arg5[%c0_5, %c0_6] : memref<1x128xf32, #tpu.memory_space<vmem>>, vector<1x128xf32>
    %7 = vector.broadcast %6 : vector<1x128xf32> to vector<1024x128xf32>
    %8 = arith.addf %5, %7 : vector<1024x128xf32>
    %cst_7 = arith.constant 0.000000e+00 : f32
    %9 = vector.broadcast %cst_7 : f32 to vector<1024x128xf32>
    %10 = arith.cmpf oge, %8, %9 : vector<1024x128xf32>
    %cst_8 = arith.constant 1.000000e-01 : f32
    %11 = vector.broadcast %cst_8 : f32 to vector<1024x128xf32>
    %12 = arith.mulf %11, %8 : vector<1024x128xf32>
    %13 = arith.select %10, %8, %12 : vector<1024x128xi1>, vector<1024x128xf32>
    %14 = arith.truncf %13 : vector<1024x128xf32> to vector<1024x128xbf16>
    %c0_9 = arith.constant 0 : index
    %c0_10 = arith.constant 0 : index
    %15 = vector.load %arg6[%c0_9, %c0_10] : memref<1024x128xbf16, #tpu.memory_space<vmem>>, vector<1024x128xbf16>
    tpu.vector_store %arg6[%c0_9, %c0_10], %14 {strides = array<i32>} : memref<1024x128xbf16, #tpu.memory_space<vmem>>, vector<1024x128xbf16>,
    return
  }
  func.func @transform_0(%arg0: i32, %arg1: i32) -> (i32, i32) {
    %c0_i32 = arith.constant 0 : i32
    %c0_i32_0 = arith.constant 0 : i32
    return %arg0, %c0_i32 : i32, i32
  }
  func.func @transform_1(%arg0: i32, %arg1: i32) -> (i32, i32) {
    %c0_i32 = arith.constant 0 : i32
    %c0_i32_0 = arith.constant 0 : i32
    return %c0_i32, %arg1 : i32, i32
  }
  func.func @transform_2(%arg0: i32, %arg1: i32) -> (i32, i32) {
    %c0_i32 = arith.constant 0 : i32
    %c0_i32_0 = arith.constant 0 : i32
    return %c0_i32, %arg1 : i32, i32
  }
  func.func @transform_3(%arg0: i32, %arg1: i32) -> (i32, i32) {
    %c0_i32 = arith.constant 0 : i32
    %c0_i32_0 = arith.constant 0 : i32
    return %c0_i32, %arg1 : i32, i32
  }
  func.func @transform_4(%arg0: i32, %arg1: i32) -> (i32, i32) {
    %c0_i32 = arith.constant 0 : i32
    return %arg0, %arg1 : i32, i32
  }
}

</mosaic_0001>

<bundles_post_ra>
// kernel: conv_bn_lrelu.1
= control target key start
LH: loop header
LB: loop body
LE: loop exit
PB: predicated region body
PF: predicated region fallthrough
CT: control target
= control target key end

     0   :  { %9 = vsyncpa [#allocation3], 0  ;;  %s4948_s0 = inlined_call_operand.vmem [shape: bf16[8192,27], index: 0, kind: input, shape index: {}]   ;;  %s4949_s1 = inlined_call_operand.vmem [shape: bf16[27,128], index: 1, kind: input, shape index: {}]   ;;  %s4950_s2 = inlined_call_operand.vmem [shape: f32[1,128], index: 2, kind: input, shape index: {}]   ;;  %s4951_s3 = inlined_call_operand.vmem [shape: f32[1,128], index: 3, kind: input, shape index: {}]   ;;  %s4952_s4 = inlined_call_operand.hbm [shape: bf16[8192,128], index: 4, kind: output, shape index: {}]  }
   0x1   :  { %11 = vsyncpa [#allocation3 + $0x1], 0  ;;  %s4110_s15 = smov 0   ;;  %s4112_s16 = smov 0  }
   0x2   :  { %s4114_s17 = smov 0   ;;  %s4116_s18 = smov 0  }
   0x3   :  { %s4118_s19 = smov 0   ;;  %s4120_s20 = smov 0  }
   0x4 LB: > { %s2887_s21 = sadd.s32 4294967295, %s4079_s20   ;;  %s2888_s22 = sadd.s32 4294967294, %s4079_s20   ;;  %s4079_s20 = sphi %s4120_s20, %s17_s20   ;;  %s4075_s19 = sphi %s4118_s19, %s4959_s19   ;;  %s4071_s18 = sphi %s4116_s18, %s4958_s18   ;;  %s4067_s17 = sphi %s4114_s17, %s4957_s17   ;;  %s4063_s16 = sphi %s4112_s16, %s4956_s16   ;;  %s4059_s15 = sphi %s4110_s15, %s4955_s15  }
   0x5   : > { %s29_s23 = sadd.s32 1, %s4075_s19  ;;  %s142_s24 = sadd.s32 1, %s4067_s17 }
   0x6   : > { %p31_p0 = scmp.ge.s32.totalorder %s29_s23, 8  ;;  %p152_p1 = scmp.ne.s32.totalorder %s4067_s17, %s4063_s16 }
   0x7   : > { %p153_p2 = scmp.eq.s32.totalorder %s2887_s21, 7  ;;  %p158_p3 = scmp.ne.s32.totalorder %s4063_s16, %s4059_s15 }
   0x8   : > { %s4961_s23 = smov (%p31_p0, %s29_s23), 0  ;;  %p159_p5 = scmp.eq.s32.totalorder %s2888_s22, 7 }
   0x9   : > { %p4150_p4 = por %p153_p2, %p152_p1  ;;  %s137_s26 = ssub.s32 %s4075_s19, %s4961_s23 }
   0xa   : > { %p2894_p6 = scmp.ge.s32.totalorder %s4079_s20, 1  ;;  %p140_p7 = scmp.eq.s32.totalorder %s137_s26, 0 }
   0xb   : > { %p4157_p8 = por %p159_p5, %p158_p3  ;;  %p205_p9 = scmp.lt.s32.totalorder %s4079_s20, 9 }
   0xc   : > { %s4163_s28 = scalar_select %p140_p7, %s4067_s17, %s142_s24  }
   0xd   : > { %p206_p10 = pnand %p2894_p6, %p205_p9 }
   0xe   : > { %s2896_s5 = sshll.u32 (!%p206_p10), %s4071_s18, 7  ;;  %s238_s22 = sand.u32 (!%p206_p10), 1, %s4063_s16  }
   0xf   : > { %209 = sbr.rel (%p206_p10) target bundleno = 423 (0x1a7), region = 36  ;;  %p242_p11 = scmp.lt.s32.totalorder (!%p206_p10), %s2896_s5, 1023 }
  0x10   : > { %s2895_s24 = sshll.u32 (!%p206_p10), %s238_s22, 9  ;;  %s3291_s7 = sshll.u32 (!%p206_p10), %s4071_s18, 13 }
  0x11   : > { %s4338_s26 = scalar_lea.vmem (!%p206_p10), [#allocation2], %s2895_s24  ;;  %s4903_s18 = scalar_lea.sflag (!%p206_p10), [#allocation3], %s238_s22 }
  0x12   : > { %s4082_s13 = smov (!%p206_p10), [#allocation2]  }
  0x13   : > { %s4007_s14 = sshll.u32 (!%p206_p10), %s4082_s13, 4  ;;  %s4008_s14 = int_to_ptr.vmem [resolvable:$false] %s4007_s14 }
  0x14   : > { %v3935_v0 = vld [vmem:[%s4949_s1 + $0x8] sm:$0x3f]   ;;  %vm915_vm0 = vcmask 1044480   ;;  %vm916_vm1 = vcmask 1045504   ;;  %v4081_v1 = vmov 65535   ;;  %v3936_v5 = vld [vmem:[%s4949_s1] sm:$0xff]  }
  0x15   : > { %v917_v2 = vsel %vm915_vm0, 4294967295, %v4081_v1  ;;  %s4963_s5 = smov (!%p242_p11, %s2896_s5), 1023  ;;  %vm722_vm2 = vcmask 220160   ;;  %s4009_s21 = scalar_lea.vmem %s4008_s14, 16384 }
  0x16   : > { %v918_v3 = vsel %vm916_vm1, %v917_v2, 0  ;;  %s2897_s8 = sshll.u32 %s4963_s5, 2 }
  0x17   : > { %v920_v4 = vand.u32 %v3935_v0, %v918_v3  ;;  %s4175_s11 = scalar_lea.vmem %s4948_s0, %s2897_s8  ;;  %s2776_s8 = sshll.u32 %s4338_s26, 4  ;;  %s4898_s8 = int_to_ptr.vmem [resolvable:$true] %s2776_s8 }
  0x18   : > { %v3937_v6 = vld [vmem:[%s4175_s11] sm:$0xff]   ;;  %v3939_v8 = vld [vmem:[%s4175_s11 + $0x8] sm:$0xff]   ;;  %v3941_v10 = vld [vmem:[%s4175_s11 + $0x10] sm:$0xff]   ;;  %s4003_s12 = scalar_lea.vmem %s4898_s8, 8192  ;;  %p4010_p1 = scmp.lt.s32.totalorder %s4898_s8, %s4008_s14 }
  0x19   : > { %3741 = vmatprep.subr.bf16.mxu0 %v920_v4  ;;  %3873 = vmatprep.subr.bf16.mxu1 %v920_v4  ;;  %v3938_v7 = vld [vmem:[%s4175_s11 + $0x100] sm:$0xff]   ;;  %v3940_v9 = vld [vmem:[%s4175_s11 + $0x108] sm:$0xff]   ;;  %v3942_v11 = vld [vmem:[%s4175_s11 + $0x110] sm:$0xff]   ;;  %p4004_p12 = scmp.ne.s32.totalorder %s4898_s8, %s4003_s12  ;;  %p4011_p2 = scmp.lt.s32.totalorder %s4009_s21, %s4003_s12 }
  0x1a   : > { %3742 = vmatpush3.bf16.msra.mxu0 %v920_v4  ;;  %3875 = vmatpush3.bf16.msra.mxu1 %v920_v4  ;;  %v3943_v12 = vld [vmem:[%s4175_s11 + $0x18] sm:$0xff]   ;;  %v3945_v14 = vld [vmem:[%s4175_s11 + $0x20] sm:$0xff]   ;;  %v3947_v16 = vld [vmem:[%s4175_s11 + $0x28] sm:$0xff]  }
  0x1b   : > { %3743 = vmatprep.subr.bf16.mxu0 %v3936_v5  ;;  %3874 = vmatprep.subr.bf16.mxu1 %v3936_v5  ;;  %v3944_v13 = vld [vmem:[%s4175_s11 + $0x118] sm:$0xff]   ;;  %v3946_v15 = vld [vmem:[%s4175_s11 + $0x120] sm:$0xff]   ;;  %v3948_v17 = vld [vmem:[%s4175_s11 + $0x128] sm:$0xff]   ;;  %p4005_p13 = pnand %p4004_p12, %p4150_p4  ;;  %p4012_p3 = por %p4011_p2, %p4010_p1 }
  0x1c   : > { %3745 = vmatprep.mubr.msk.bf16.mxu0 %vm722_vm2, %v3937_v6  ;;  %3809 = vmatprep.mubr.msk.bf16.mxu1 %vm722_vm2, %v3938_v7  ;;  %v3949_v18 = vld [vmem:[%s4175_s11 + $0x30] sm:$0xff]   ;;  %v3951_v20 = vld [vmem:[%s4175_s11 + $0x38] sm:$0xff]   ;;  %v3953_v22 = vld [vmem:[%s4175_s11 + $0x40] sm:$0xff]  }
  0x1d   : > { %v3950_v19 = vld [vmem:[%s4175_s11 + $0x130] sm:$0xff]   ;;  %v3952_v21 = vld [vmem:[%s4175_s11 + $0x138] sm:$0xff]   ;;  %v3954_v23 = vld [vmem:[%s4175_s11 + $0x140] sm:$0xff]   ;;  %p4006_p0 = pneg %p4005_p13 }
  0x1e   : > { %3744 = vmatpush3.bf16.msra.mxu0 %v3936_v5  ;;  %3876 = vmatpush3.bf16.msra.mxu1 %v3936_v5  ;;  %v3955_v24 = vld [vmem:[%s4175_s11 + $0x48] sm:$0xff]   ;;  %v3957_v26 = vld [vmem:[%s4175_s11 + $0x50] sm:$0xff]   ;;  %v3959_v28 = vld [vmem:[%s4175_s11 + $0x58] sm:$0xff]  }
  0x1f   : > { %v3956_v25 = vld [vmem:[%s4175_s11 + $0x148] sm:$0xff]   ;;  %v3958_v27 = vld [vmem:[%s4175_s11 + $0x150] sm:$0xff]   ;;  %v3960_v29 = vld [vmem:[%s4175_s11 + $0x158] sm:$0xff]   ;;  %p4013_p5 = pnand %p4012_p3, %p4006_p0 }
  0x20   : > { %v3961_v30 = vld [vmem:[%s4175_s11 + $0x60] sm:$0xff]   ;;  %v3963_v32 = vld [vmem:[%s4175_s11 + $0x68] sm:$0xff]   ;;  %v3965_v34 = vld [vmem:[%s4175_s11 + $0x70] sm:$0xff]  }
  0x21   : > { %3746 = vmatmul.mubr.msk.bf16.vlgmr.msra.gmra.mxu0 %vm722_vm2, %v3939_v8  ;;  %3810 = vmatmul.mubr.msk.bf16.vlgmr.msra.gmra.mxu1 %vm722_vm2, %v3940_v9  ;;  %v3962_v31 = vld [vmem:[%s4175_s11 + $0x160] sm:$0xff]   ;;  %v3964_v33 = vld [vmem:[%s4175_s11 + $0x168] sm:$0xff]   ;;  %v3966_v35 = vld [vmem:[%s4175_s11 + $0x170] sm:$0xff]  }
  0x22   : > { %3749 = vmatprep.mubr.msk.bf16.mxu0 %vm722_vm2, %v3941_v10  ;;  %3813 = vmatprep.mubr.msk.bf16.mxu1 %vm722_vm2, %v3942_v11  ;;  %v3967_v36 = vld [vmem:[%s4175_s11 + $0x78] sm:$0xff]   ;;  %v3969_v38 = vld [vmem:[%s4175_s11 + $0x80] sm:$0xff]   ;;  %v3971_v40 = vld [vmem:[%s4175_s11 + $0x88] sm:$0xff]  }
  0x23   : > { %v3968_v37 = vld [vmem:[%s4175_s11 + $0x178] sm:$0xff]   ;;  %v3970_v39 = vld [vmem:[%s4175_s11 + $0x180] sm:$0xff]   ;;  %v3972_v41 = vld [vmem:[%s4175_s11 + $0x188] sm:$0xff]  }
  0x24   : > { %v3973_v42 = vld [vmem:[%s4175_s11 + $0x90] sm:$0xff]   ;;  %v3975_v44 = vld [vmem:[%s4175_s11 + $0x98] sm:$0xff]   ;;  %v3977_v46 = vld [vmem:[%s4175_s11 + $0xa0] sm:$0xff]  }
  0x25   : > { %v3974_v43 = vld [vmem:[%s4175_s11 + $0x190] sm:$0xff]   ;;  %v3976_v45 = vld [vmem:[%s4175_s11 + $0x198] sm:$0xff]   ;;  %v3978_v47 = vld [vmem:[%s4175_s11 + $0x1a0] sm:$0xff]  }
  0x26   : > { %v3979_v48 = vld [vmem:[%s4175_s11 + $0xa8] sm:$0xff]   ;;  %v3981_v50 = vld [vmem:[%s4175_s11 + $0xb0] sm:$0xff]   ;;  %v3983_v52 = vld [vmem:[%s4175_s11 + $0xb8] sm:$0xff]  }
  0x27   : > { %v3980_v49 = vld [vmem:[%s4175_s11 + $0x1a8] sm:$0xff]   ;;  %v3982_v51 = vld [vmem:[%s4175_s11 + $0x1b0] sm:$0xff]   ;;  %v3984_v53 = vld [vmem:[%s4175_s11 + $0x1b8] sm:$0xff]  }
  0x28   : > { %v3985_v54 = vld [vmem:[%s4175_s11 + $0xc0] sm:$0xff]   ;;  %v3987_v56 = vld [vmem:[%s4175_s11 + $0xc8] sm:$0xff]   ;;  %v3989_v58 = vld [vmem:[%s4175_s11 + $0xd0] sm:$0xff]  }
  0x29   : > { %3750 = vmatmul.mubr.msk.bf16.gmra.mxu0 %vm722_vm2, %v3943_v12  ;;  %3814 = vmatmul.mubr.msk.bf16.gmra.mxu1 %vm722_vm2, %v3944_v13  ;;  %v3986_v55 = vld [vmem:[%s4175_s11 + $0x1c0] sm:$0xff]   ;;  %v3988_v57 = vld [vmem:[%s4175_s11 + $0x1c8] sm:$0xff]   ;;  %v3990_v59 = vld [vmem:[%s4175_s11 + $0x1d0] sm:$0xff]  }
  0x2a   : > { %3753 = vmatprep.mubr.msk.bf16.mxu0 %vm722_vm2, %v3945_v14  ;;  %3817 = vmatprep.mubr.msk.bf16.mxu1 %vm722_vm2, %v3946_v15  ;;  %v3991_v60 = vld [vmem:[%s4175_s11 + $0xd8] sm:$0xff]   ;;  %v3993_v62 = vld [vmem:[%s4175_s11 + $0xe0] sm:$0xff]   ;;  %v3995_v0 = vld [vmem:[%s4175_s11 + $0xe8] sm:$0xff]  }
  0x2b   : > { %v3992_v61 = vld [vmem:[%s4175_s11 + $0x1d8] sm:$0xff]   ;;  %v3994_v63 = vld [vmem:[%s4175_s11 + $0x1e0] sm:$0xff]   ;;  %v3996_v1 = vld [vmem:[%s4175_s11 + $0x1e8] sm:$0xff]  }
  0x2c   : > { %v3997_v2 = vld [vmem:[%s4175_s11 + $0xf0] sm:$0xff]   ;;  %v3999_v4 = vld [vmem:[%s4175_s11 + $0xf8] sm:$0xff]   ;;  %v4308_v6 = vld [vmem:[%s4950_s2] ss:$0 sm:$0xff] }
  0x2d   : > { %v3998_v3 = vld [vmem:[%s4175_s11 + $0x1f0] sm:$0xff]   ;;  %v4000_v5 = vld [vmem:[%s4175_s11 + $0x1f8] sm:$0xff]   ;;  %v4313_v8 = vld [vmem:[%s4951_s3] ss:$0 sm:$0xff]  ;;  %s4896_s11 = scalar_lea.hbm %s4952_s4, %s3291_s7 }
  0x31   : > { %3754 = vmatmul.mubr.msk.bf16.gmra.mxu0 %vm722_vm2, %v3947_v16  ;;  %3818 = vmatmul.mubr.msk.bf16.gmra.mxu1 %vm722_vm2, %v3948_v17 }
  0x32   : > { %3757 = vmatprep.mubr.msk.bf16.mxu0 %vm722_vm2, %v3949_v18  ;;  %3821 = vmatprep.mubr.msk.bf16.mxu1 %vm722_vm2, %v3950_v19 }
  0x39   : > { %3758 = vmatmul.mubr.msk.bf16.gmra.mxu0 %vm722_vm2, %v3951_v20  ;;  %3822 = vmatmul.mubr.msk.bf16.gmra.mxu1 %vm722_vm2, %v3952_v21 }
  0x3a   : > { %3761 = vmatprep.mubr.msk.bf16.mxu0 %vm722_vm2, %v3953_v22  ;;  %3825 = vmatprep.mubr.msk.bf16.mxu1 %vm722_vm2, %v3954_v23 }
  0x41   : > { %3762 = vmatmul.mubr.msk.bf16.gmra.mxu0 %vm722_vm2, %v3955_v24  ;;  %3826 = vmatmul.mubr.msk.bf16.gmra.mxu1 %vm722_vm2, %v3956_v25 }
  0x42   : > { %3765 = vmatprep.mubr.msk.bf16.mxu0 %vm722_vm2, %v3957_v26  ;;  %3829 = vmatprep.mubr.msk.bf16.mxu1 %vm722_vm2, %v3958_v27 }
  0x49   : > { %3766 = vmatmul.mubr.msk.bf16.gmra.mxu0 %vm722_vm2, %v3959_v28  ;;  %3830 = vmatmul.mubr.msk.bf16.gmra.mxu1 %vm722_vm2, %v3960_v29 }
  0x4a   : > { %3769 = vmatprep.mubr.msk.bf16.mxu0 %vm722_vm2, %v3961_v30  ;;  %3833 = vmatprep.mubr.msk.bf16.mxu1 %vm722_vm2, %v3962_v31 }
  0x51   : > { %3770 = vmatmul.mubr.msk.bf16.gmra.mxu0 %vm722_vm2, %v3963_v32  ;;  %3834 = vmatmul.mubr.msk.bf16.gmra.mxu1 %vm722_vm2, %v3964_v33 }
  0x52   : > { %3773 = vmatprep.mubr.msk.bf16.mxu0 %vm722_vm2, %v3965_v34  ;;  %3837 = vmatprep.mubr.msk.bf16.mxu1 %vm722_vm2, %v3966_v35 }
  0x59   : > { %3774 = vmatmul.mubr.msk.bf16.gmra.mxu0 %vm722_vm2, %v3967_v36  ;;  %3838 = vmatmul.mubr.msk.bf16.gmra.mxu1 %vm722_vm2, %v3968_v37 }
  0x5a   : > { %3777 = vmatprep.mubr.msk.bf16.mxu0 %vm722_vm2, %v3969_v38  ;;  %3841 = vmatprep.mubr.msk.bf16.mxu1 %vm722_vm2, %v3970_v39 }
  0x61   : > { %3778 = vmatmul.mubr.msk.bf16.gmra.mxu0 %vm722_vm2, %v3971_v40  ;;  %3842 = vmatmul.mubr.msk.bf16.gmra.mxu1 %vm722_vm2, %v3972_v41 }
  0x62   : > { %3781 = vmatprep.mubr.msk.bf16.mxu0 %vm722_vm2, %v3973_v42  ;;  %3845 = vmatprep.mubr.msk.bf16.mxu1 %vm722_vm2, %v3974_v43 }
  0x69   : > { %3782 = vmatmul.mubr.msk.bf16.gmra.mxu0 %vm722_vm2, %v3975_v44  ;;  %3846 = vmatmul.mubr.msk.bf16.gmra.mxu1 %vm722_vm2, %v3976_v45 }
  0x6a   : > { %3785 = vmatprep.mubr.msk.bf16.mxu0 %vm722_vm2, %v3977_v46  ;;  %3849 = vmatprep.mubr.msk.bf16.mxu1 %vm722_vm2, %v3978_v47 }
  0x71   : > { %3786 = vmatmul.mubr.msk.bf16.gmra.mxu0 %vm722_vm2, %v3979_v48  ;;  %3850 = vmatmul.mubr.msk.bf16.gmra.mxu1 %vm722_vm2, %v3980_v49 }
  0x72   : > { %3789 = vmatprep.mubr.msk.bf16.mxu0 %vm722_vm2, %v3981_v50  ;;  %3853 = vmatprep.mubr.msk.bf16.mxu1 %vm722_vm2, %v3982_v51 }
  0x79   : > { %3790 = vmatmul.mubr.msk.bf16.gmra.mxu0 %vm722_vm2, %v3983_v52  ;;  %3854 = vmatmul.mubr.msk.bf16.gmra.mxu1 %vm722_vm2, %v3984_v53 }
  0x7a   : > { %3793 = vmatprep.mubr.msk.bf16.mxu0 %vm722_vm2, %v3985_v54  ;;  %3857 = vmatprep.mubr.msk.bf16.mxu1 %vm722_vm2, %v3986_v55 }
  0x81   : > { %3794 = vmatmul.mubr.msk.bf16.gmra.mxu0 %vm722_vm2, %v3987_v56  ;;  %3858 = vmatmul.mubr.msk.bf16.gmra.mxu1 %vm722_vm2, %v3988_v57 }
  0x82   : > { %3797 = vmatprep.mubr.msk.bf16.mxu0 %vm722_vm2, %v3989_v58  ;;  %3861 = vmatprep.mubr.msk.bf16.mxu1 %vm722_vm2, %v3990_v59 }
  0x89   : > { %3798 = vmatmul.mubr.msk.bf16.gmra.mxu0 %vm722_vm2, %v3991_v60  ;;  %3862 = vmatmul.mubr.msk.bf16.gmra.mxu1 %vm722_vm2, %v3992_v61 }
  0x8a   : > { %3801 = vmatprep.mubr.msk.bf16.mxu0 %vm722_vm2, %v3993_v62  ;;  %3865 = vmatprep.mubr.msk.bf16.mxu1 %vm722_vm2, %v3994_v63 }
  0x91   : > { %3802 = vmatmul.mubr.msk.bf16.gmra.mxu0 %vm722_vm2, %v3995_v0  ;;  %3866 = vmatmul.mubr.msk.bf16.gmra.mxu1 %vm722_vm2, %v3996_v1 }
  0x92   : > { %3805 = vmatprep.mubr.msk.bf16.mxu0 %vm722_vm2, %v3997_v2  ;;  %3869 = vmatprep.mubr.msk.bf16.mxu1 %vm722_vm2, %v3998_v3 }
  0x99   : > { %3806 = vmatmul.mubr.msk.bf16.gmra.mxu0 %vm722_vm2, %v3999_v4  ;;  %3870 = vmatmul.mubr.msk.bf16.gmra.mxu1 %vm722_vm2, %v4000_v5 }
  0xe1   : > { %v3747_v7 = vpop.f32.mrf.mxu0  ;;  %v3811_v9 = vpop.f32.mrf.mxu1 }
  0xe2   : > { %v1476_v10 = vmul.f32 %v3747_v7, %v4308_v6  ;;  %v1540_v11 = vmul.f32 %v3811_v9, %v4308_v6 }
  0xe3   : > { %v956_v12 = vpop.f32.mrf.mxu0  ;;  %v1212_v13 = vpop.f32.mrf.mxu1 }
  0xe4   : > { %v1611_v14 = vadd.f32 %v4313_v8, %v1476_v10  ;;  %v1675_v15 = vadd.f32 %v4313_v8, %v1540_v11  ;;  %v1474_v16 = vmul.f32 %v4308_v6, %v956_v12  ;;  %v1538_v17 = vmul.f32 %v4308_v6, %v1212_v13 }
  0xe5   : > { %v3748_v18 = vpop.f32.mrf.mxu0  ;;  %v3812_v19 = vpop.f32.mrf.mxu1 }
  0xe6   : > { %vm1739_vm3 = vcmp.ge.f32.partialorder %v1611_v14, 0.0  ;;  %v1867_v20 = vmul.f32 0.1, %v1611_v14  ;;  %vm1803_vm4 = vcmp.ge.f32.partialorder %v1675_v15, 0.0  ;;  %v1931_v21 = vmul.f32 0.1, %v1675_v15 }
  0xe7   : > { %v1609_v22 = vadd.f32 %v4313_v8, %v1474_v16  ;;  %v1673_v23 = vadd.f32 %v4313_v8, %v1538_v17  ;;  %v1477_v24 = vmul.f32 %v3748_v18, %v4308_v6  ;;  %v1541_v25 = vmul.f32 %v3812_v19, %v4308_v6  ;;  %v959_v26 = vpop.f32.mrf.mxu0  ;;  %v1215_v27 = vpop.f32.mrf.mxu1 }
  0xe8   : > { %v1995_v28 = vsel %vm1739_vm3, %v1611_v14, %v1867_v20  ;;  %v2059_v29 = vsel %vm1803_vm4, %v1675_v15, %v1931_v21  ;;  %v1475_v30 = vmul.f32 %v4308_v6, %v959_v26  ;;  %v1539_v31 = vmul.f32 %v4308_v6, %v1215_v27 }
  0xe9   : > { %vm1737_vm5 = vcmp.ge.f32.partialorder %v1609_v22, 0.0  ;;  %v1865_v32 = vmul.f32 0.1, %v1609_v22  ;;  %vm1801_vm6 = vcmp.ge.f32.partialorder %v1673_v23, 0.0  ;;  %v1929_v33 = vmul.f32 0.1, %v1673_v23  ;;  %v3751_v34 = vpop.f32.mrf.mxu0  ;;  %v3815_v35 = vpop.f32.mrf.mxu1 }
  0xea   : > { %v1612_v36 = vadd.f32 %v4313_v8, %v1477_v24  ;;  %v1676_v37 = vadd.f32 %v4313_v8, %v1541_v25  ;;  %v1610_v38 = vadd.f32 %v4313_v8, %v1475_v30  ;;  %v1674_v39 = vadd.f32 %v4313_v8, %v1539_v31 }
  0xeb   : > { %v1993_v40 = vsel %vm1737_vm5, %v1609_v22, %v1865_v32  ;;  %v2057_v41 = vsel %vm1801_vm6, %v1673_v23, %v1929_v33  ;;  %v1480_v42 = vmul.f32 %v3751_v34, %v4308_v6  ;;  %v1544_v43 = vmul.f32 %v3815_v35, %v4308_v6  ;;  %v972_v44 = vpop.f32.mrf.mxu0  ;;  %v1228_v45 = vpop.f32.mrf.mxu1 }
  0xec   : > { %vm1740_vm7 = vcmp.ge.f32.partialorder %v1612_v36, 0.0  ;;  %v1868_v46 = vmul.f32 0.1, %v1612_v36  ;;  %vm1804_vm8 = vcmp.ge.f32.partialorder %v1676_v37, 0.0  ;;  %v1932_v47 = vmul.f32 0.1, %v1676_v37 }
  0xed   : > { %vm1738_vm9 = vcmp.ge.f32.partialorder %v1610_v38, 0.0  ;;  %v1866_v48 = vmul.f32 0.1, %v1610_v38  ;;  %vm1802_vm10 = vcmp.ge.f32.partialorder %v1674_v39, 0.0  ;;  %v1930_v49 = vmul.f32 0.1, %v1674_v39  ;;  %v3752_v50 = vpop.f32.mrf.mxu0  ;;  %v3816_v51 = vpop.f32.mrf.mxu1 }
  0xee   : > { %v1996_v52 = vsel %vm1740_vm7, %v1612_v36, %v1868_v46  ;;  %v2060_v53 = vsel %vm1804_vm8, %v1676_v37, %v1932_v47  ;;  %v1615_v54 = vadd.f32 %v4313_v8, %v1480_v42  ;;  %v1679_v55 = vadd.f32 %v4313_v8, %v1544_v43 }
  0xef   : > { %v3300_v56 = vpack.c.bf16 %v1996_v52, %v1995_v28  ;;  %v3460_v57 = vpack.c.bf16 %v2060_v53, %v2059_v29  ;;  %v1994_v58 = vsel %vm1738_vm9, %v1610_v38, %v1866_v48  ;;  %v2058_v59 = vsel %vm1802_vm10, %v1674_v39, %v1930_v49  ;;  %v975_v60 = vpop.f32.mrf.mxu0  ;;  %v1231_v61 = vpop.f32.mrf.mxu1 }
  0xf0   : > { %v3295_v62 = vpack.c.bf16 %v1994_v58, %v1993_v40  ;;  %v3455_v63 = vpack.c.bf16 %v2058_v59, %v2057_v41  ;;  %vm1743_vm11 = vcmp.ge.f32.partialorder %v1615_v54, 0.0  ;;  %v1871_v0 = vmul.f32 0.1, %v1615_v54 }
  0xf1   : > { %3612 = vst [vmem:[%s4338_s26 + $0x8] sm:$0xff] %v3300_v56   ;;  %3644 = vst [vmem:[%s4338_s26 + $0x108] sm:$0xff] %v3460_v57   ;;  %vm1807_vm12 = vcmp.ge.f32.partialorder %v1679_v55, 0.0  ;;  %v1935_v1 = vmul.f32 0.1, %v1679_v55  ;;  %v1478_v2 = vmul.f32 %v4308_v6, %v972_v44  ;;  %v1542_v3 = vmul.f32 %v4308_v6, %v1228_v45  ;;  %v3755_v4 = vpop.f32.mrf.mxu0  ;;  %v3819_v5 = vpop.f32.mrf.mxu1 }
  0xf2   : > { %3296 = vst [vmem:[%s4338_s26] sm:$0xff] %v3295_v62   ;;  %3643 = vst [vmem:[%s4338_s26 + $0x100] sm:$0xff] %v3455_v63   ;;  %v1999_v7 = vsel %vm1743_vm11, %v1615_v54, %v1871_v0  ;;  %v1481_v9 = vmul.f32 %v3752_v50, %v4308_v6  ;;  %v1545_v10 = vmul.f32 %v3816_v51, %v4308_v6 }
  0xf3   : > { %v1479_v11 = vmul.f32 %v4308_v6, %v975_v60  ;;  %v2063_v12 = vsel %vm1807_vm12, %v1679_v55, %v1935_v1  ;;  %v1613_v13 = vadd.f32 %v4313_v8, %v1478_v2  ;;  %v1677_v14 = vadd.f32 %v4313_v8, %v1542_v3  ;;  %v988_v16 = vpop.f32.mrf.mxu0  ;;  %v1244_v17 = vpop.f32.mrf.mxu1 }
  0xf4   : > { %v1543_v15 = vmul.f32 %v4308_v6, %v1231_v61  ;;  %v1616_v18 = vadd.f32 %v4313_v8, %v1481_v9  ;;  %v1680_v19 = vadd.f32 %v4313_v8, %v1545_v10  ;;  %v1484_v21 = vmul.f32 %v3755_v4, %v4308_v6 }
  0xf5   : > { %v1614_v20 = vadd.f32 %v4313_v8, %v1479_v11  ;;  %vm1741_vm13 = vcmp.ge.f32.partialorder %v1613_v13, 0.0  ;;  %v1869_v22 = vmul.f32 0.1, %v1613_v13  ;;  %vm1805_vm14 = vcmp.ge.f32.partialorder %v1677_v14, 0.0  ;;  %v3756_v24 = vpop.f32.mrf.mxu0  ;;  %v3820_v25 = vpop.f32.mrf.mxu1 }
  0xf6   : > { %v1933_v23 = vmul.f32 0.1, %v1677_v14  ;;  %vm1744_vm15 = vcmp.ge.f32.partialorder %v1616_v18, 0.0  ;;  %v1872_v26 = vmul.f32 0.1, %v1616_v18  ;;  %vm1808_vm0 = vcmp.ge.f32.partialorder %v1680_v19, 0.0 }
  0xf7   : > { %v1936_v27 = vmul.f32 0.1, %v1680_v19  ;;  %v1997_v28 = vsel %vm1741_vm13, %v1613_v13, %v1869_v22  ;;  %vm1742_vm1 = vcmp.ge.f32.partialorder %v1614_v20, 0.0  ;;  %v1870_v30 = vmul.f32 0.1, %v1614_v20  ;;  %v991_v31 = vpop.f32.mrf.mxu0  ;;  %v1247_v32 = vpop.f32.mrf.mxu1 }
  0xf8   : > { %v2061_v29 = vsel %vm1805_vm14, %v1677_v14, %v1933_v23  ;;  %v2000_v33 = vsel %vm1744_vm15, %v1616_v18, %v1872_v26  ;;  %v1678_v35 = vadd.f32 %v4313_v8, %v1543_v15  ;;  %v1619_v36 = vadd.f32 %v4313_v8, %v1484_v21 }
  0xf9   : > { %v2064_v34 = vsel %vm1808_vm0, %v1680_v19, %v1936_v27  ;;  %v3310_v37 = vpack.c.bf16 %v2000_v33, %v1999_v7  ;;  %v1998_v39 = vsel %vm1742_vm1, %v1614_v20, %v1870_v30  ;;  %v1548_v40 = vmul.f32 %v3819_v5, %v4308_v6  ;;  %v3759_v41 = vpop.f32.mrf.mxu0  ;;  %v3823_v42 = vpop.f32.mrf.mxu1 }
  0xfa   : > { %v3470_v38 = vpack.c.bf16 %v2064_v34, %v2063_v12  ;;  %v3305_v43 = vpack.c.bf16 %v1998_v39, %v1997_v28  ;;  %vm1806_vm2 = vcmp.ge.f32.partialorder %v1678_v35, 0.0  ;;  %v1934_v44 = vmul.f32 0.1, %v1678_v35 }
  0xfb   : > { %vm1747_vm3 = vcmp.ge.f32.partialorder %v1619_v36, 0.0  ;;  %3614 = vst [vmem:[%s4338_s26 + $0x18] sm:$0xff] %v3310_v37   ;;  %v1875_v45 = vmul.f32 0.1, %v1619_v36  ;;  %v1683_v46 = vadd.f32 %v4313_v8, %v1548_v40  ;;  %v1482_v47 = vmul.f32 %v4308_v6, %v988_v16  ;;  %v1004_v49 = vpop.f32.mrf.mxu0  ;;  %v1260_v50 = vpop.f32.mrf.mxu1 }
  0xfc   : > { %3646 = vst [vmem:[%s4338_s26 + $0x118] sm:$0xff] %v3470_v38   ;;  %v1546_v48 = vmul.f32 %v4308_v6, %v1244_v17  ;;  %3613 = vst [vmem:[%s4338_s26 + $0x10] sm:$0xff] %v3305_v43   ;;  %v2062_v51 = vsel %vm1806_vm2, %v1678_v35, %v1934_v44  ;;  %v1485_v52 = vmul.f32 %v3756_v24, %v4308_v6 }
  0xfd   : > { %v1549_v53 = vmul.f32 %v3820_v25, %v4308_v6  ;;  %v1483_v54 = vmul.f32 %v4308_v6, %v991_v31  ;;  %v3465_v55 = vpack.c.bf16 %v2062_v51, %v2061_v29  ;;  %v2003_v56 = vsel %vm1747_vm3, %v1619_v36, %v1875_v45  ;;  %v3760_v58 = vpop.f32.mrf.mxu0  ;;  %v3824_v59 = vpop.f32.mrf.mxu1 }
  0xfe   : > { %vm1811_vm4 = vcmp.ge.f32.partialorder %v1683_v46, 0.0  ;;  %v1939_v57 = vmul.f32 0.1, %v1683_v46  ;;  %v1617_v60 = vadd.f32 %v4313_v8, %v1482_v47  ;;  %v1681_v61 = vadd.f32 %v4313_v8, %v1546_v48 }
  0xff   : > { %v1620_v62 = vadd.f32 %v4313_v8, %v1485_v52  ;;  %v1684_v63 = vadd.f32 %v4313_v8, %v1549_v53  ;;  %3645 = vst [vmem:[%s4338_s26 + $0x110] sm:$0xff] %v3465_v55   ;;  %v1618_v1 = vadd.f32 %v4313_v8, %v1483_v54  ;;  %v1547_v2 = vmul.f32 %v4308_v6, %v1247_v32  ;;  %v1007_v4 = vpop.f32.mrf.mxu0  ;;  %v1263_v5 = vpop.f32.mrf.mxu1 }
 0x100   : > { %v2067_v0 = vsel %vm1811_vm4, %v1683_v46, %v1939_v57  ;;  %v1488_v3 = vmul.f32 %v3759_v41, %v4308_v6  ;;  %vm1745_vm5 = vcmp.ge.f32.partialorder %v1617_v60, 0.0  ;;  %v1873_v7 = vmul.f32 0.1, %v1617_v60 }
 0x101   : > { %vm1809_vm6 = vcmp.ge.f32.partialorder %v1681_v61, 0.0  ;;  %v1937_v9 = vmul.f32 0.1, %v1681_v61  ;;  %vm1748_vm7 = vcmp.ge.f32.partialorder %v1620_v62, 0.0  ;;  %v1876_v10 = vmul.f32 0.1, %v1620_v62  ;;  %v3763_v12 = vpop.f32.mrf.mxu0  ;;  %v4376_v13 = vpop.f32.mrf.mxu1 }
 0x102   : > { %vm1812_vm8 = vcmp.ge.f32.partialorder %v1684_v63, 0.0  ;;  %v1940_v11 = vmul.f32 0.1, %v1684_v63  ;;  %v2001_v14 = vsel %vm1745_vm5, %v1617_v60, %v1873_v7  ;;  %vm1746_vm9 = vcmp.ge.f32.partialorder %v1618_v1, 0.0 }
 0x103   : > { %v2065_v15 = vsel %vm1809_vm6, %v1681_v61, %v1937_v9  ;;  %v1874_v16 = vmul.f32 0.1, %v1618_v1  ;;  %v2004_v17 = vsel %vm1748_vm7, %v1620_v62, %v1876_v10  ;;  %v1682_v19 = vadd.f32 %v4313_v8, %v1547_v2  ;;  %v4380_v21 = vpop.f32.mrf.mxu0  ;;  %v4382_v22 = vpop.f32.mrf.mxu1 }
 0x104   : > { %v2068_v18 = vsel %vm1812_vm8, %v1684_v63, %v1940_v11  ;;  %v1623_v20 = vadd.f32 %v4313_v8, %v1488_v3  ;;  %v3320_v23 = vpack.c.bf16 %v2004_v17, %v2003_v56  ;;  %v1552_v26 = vmul.f32 %v3823_v42, %v4308_v6 }
 0x105   : > { %v3480_v24 = vpack.c.bf16 %v2068_v18, %v2067_v0  ;;  %v2002_v25 = vsel %vm1746_vm9, %v1618_v1, %v1874_v16  ;;  %vm1810_vm10 = vcmp.ge.f32.partialorder %v1682_v19, 0.0  ;;  %v1938_v28 = vmul.f32 0.1, %v1682_v19  ;;  %v4385_v29 = vpop.f32.mrf.mxu0  ;;  %v4387_v30 = vpop.f32.mrf.mxu1 }
 0x106   : > { %v3315_v27 = vpack.c.bf16 %v2002_v25, %v2001_v14  ;;  %vm1751_vm11 = vcmp.ge.f32.partialorder %v1623_v20, 0.0  ;;  %3616 = vst [vmem:[%s4338_s26 + $0x28] sm:$0xff] %v3320_v23   ;;  %v1879_v31 = vmul.f32 0.1, %v1623_v20  ;;  %v1687_v32 = vadd.f32 %v4313_v8, %v1552_v26 }
 0x107   : > { %3648 = vst [vmem:[%s4338_s26 + $0x128] sm:$0xff] %v3480_v24   ;;  %v1486_v33 = vmul.f32 %v4308_v6, %v1004_v49  ;;  %v1550_v34 = vmul.f32 %v4308_v6, %v1260_v50  ;;  %v2066_v35 = vsel %vm1810_vm10, %v1682_v19, %v1938_v28  ;;  %v1489_v36 = vmul.f32 %v3760_v58, %v4308_v6  ;;  %v1023_v39 = vpop.f32.mrf.mxu0  ;;  %v4398_v40 = vpop.f32.mrf.mxu1 }
 0x108   : > { %3615 = vst [vmem:[%s4338_s26 + $0x20] sm:$0xff] %v3315_v27   ;;  %v1553_v37 = vmul.f32 %v3824_v59, %v4308_v6  ;;  %v1487_v38 = vmul.f32 %v4308_v6, %v1007_v4  ;;  %v3475_v41 = vpack.c.bf16 %v2066_v35, %v2065_v15  ;;  %v2007_v42 = vsel %vm1751_vm11, %v1623_v20, %v1879_v31 }
 0x109   : > { %vm1815_vm12 = vcmp.ge.f32.partialorder %v1687_v32, 0.0  ;;  %v1943_v43 = vmul.f32 0.1, %v1687_v32  ;;  %v1621_v44 = vadd.f32 %v4313_v8, %v1486_v33  ;;  %v1685_v45 = vadd.f32 %v4313_v8, %v1550_v34  ;;  %v4405_v48 = vpop.f32.mrf.mxu0  ;;  %v4407_v49 = vpop.f32.mrf.mxu1 }
 0x10a   : > { %v1624_v46 = vadd.f32 %v4313_v8, %v1489_v36  ;;  %v1688_v47 = vadd.f32 %v4313_v8, %v1553_v37  ;;  %3647 = vst [vmem:[%s4338_s26 + $0x120] sm:$0xff] %v3475_v41   ;;  %v1622_v51 = vadd.f32 %v4313_v8, %v1487_v38  ;;  %v1551_v52 = vmul.f32 %v4308_v6, %v1263_v5 }
 0x10b   : > { %v2071_v50 = vsel %vm1815_vm12, %v1687_v32, %v1943_v43  ;;  %v1492_v53 = vmul.f32 %v3763_v12, %v4308_v6  ;;  %vm1749_vm13 = vcmp.ge.f32.partialorder %v1621_v44, 0.0  ;;  %v1877_v54 = vmul.f32 0.1, %v1621_v44  ;;  %v4413_v56 = vpop.f32.mrf.mxu0  ;;  %v4415_v57 = vpop.f32.mrf.mxu1 }
 0x10c   : > { %vm1813_vm14 = vcmp.ge.f32.partialorder %v1685_v45, 0.0  ;;  %v1941_v55 = vmul.f32 0.1, %v1685_v45  ;;  %vm1752_vm15 = vcmp.ge.f32.partialorder %v1624_v46, 0.0  ;;  %v1880_v58 = vmul.f32 0.1, %v1624_v46 }
 0x10d   : > { %vm1816_vm0 = vcmp.ge.f32.partialorder %v1688_v47, 0.0  ;;  %v1944_v59 = vmul.f32 0.1, %v1688_v47  ;;  %v2005_v60 = vsel %vm1749_vm13, %v1621_v44, %v1877_v54  ;;  %vm1750_vm1 = vcmp.ge.f32.partialorder %v1622_v51, 0.0  ;;  %v4417_v63 = vpop.f32.mrf.mxu0  ;;  %v4419_v0 = vpop.f32.mrf.mxu1 }
 0x10e   : > { %v2069_v61 = vsel %vm1813_vm14, %v1685_v45, %v1941_v55  ;;  %v1878_v62 = vmul.f32 0.1, %v1622_v51  ;;  %v2008_v1 = vsel %vm1752_vm15, %v1624_v46, %v1880_v58  ;;  %v1686_v3 = vadd.f32 %v4313_v8, %v1551_v52 }
 0x10f   : > { %v2072_v2 = vsel %vm1816_vm0, %v1688_v47, %v1944_v59  ;;  %v1627_v4 = vadd.f32 %v4313_v8, %v1492_v53  ;;  %v3330_v5 = vpack.c.bf16 %v2008_v1, %v2007_v42  ;;  %v1556_v10 = vmul.f32 %v4376_v13, %v4308_v6  ;;  %v4425_v11 = vpop.f32.mrf.mxu0  ;;  %v4427_v12 = vpop.f32.mrf.mxu1 }
 0x110   : > { %v3490_v7 = vpack.c.bf16 %v2072_v2, %v2071_v50  ;;  %v2006_v9 = vsel %vm1750_vm1, %v1622_v51, %v1878_v62  ;;  %vm1814_vm2 = vcmp.ge.f32.partialorder %v1686_v3, 0.0  ;;  %v1942_v15 = vmul.f32 0.1, %v1686_v3 }
 0x111   : > { %v3325_v14 = vpack.c.bf16 %v2006_v9, %v2005_v60  ;;  %vm1755_vm3 = vcmp.ge.f32.partialorder %v1627_v4, 0.0  ;;  %3618 = vst [vmem:[%s4338_s26 + $0x38] sm:$0xff] %v3330_v5   ;;  %v1883_v16 = vmul.f32 0.1, %v1627_v4  ;;  %v1691_v17 = vadd.f32 %v4313_v8, %v1556_v10  ;;  %v4436_v13 = vpop.f32.mrf.mxu0  ;;  %v4438_v20 = vpop.f32.mrf.mxu1 }
 0x112   : > { %3650 = vst [vmem:[%s4338_s26 + $0x138] sm:$0xff] %v3490_v7   ;;  %v1490_v18 = vmul.f32 %v4308_v6, %v4380_v21  ;;  %v1554_v19 = vmul.f32 %v4308_v6, %v4382_v22  ;;  %v2070_v23 = vsel %vm1814_vm2, %v1686_v3, %v1942_v15  ;;  %v1493_v24 = vmul.f32 %v4385_v29, %v4308_v6 }
 0x113   : > { %3617 = vst [vmem:[%s4338_s26 + $0x30] sm:$0xff] %v3325_v14   ;;  %v1557_v25 = vmul.f32 %v4387_v30, %v4308_v6  ;;  %v1491_v26 = vmul.f32 %v4308_v6, %v1023_v39  ;;  %v3485_v27 = vpack.c.bf16 %v2070_v23, %v2069_v61  ;;  %v2011_v21 = vsel %vm1755_vm3, %v1627_v4, %v1883_v16  ;;  %v4446_v22 = vpop.f32.mrf.mxu0  ;;  %v4448_v31 = vpop.f32.mrf.mxu1 }
 0x114   : > { %vm1819_vm4 = vcmp.ge.f32.partialorder %v1691_v17, 0.0  ;;  %v1947_v28 = vmul.f32 0.1, %v1691_v17  ;;  %v1625_v32 = vadd.f32 %v4313_v8, %v1490_v18  ;;  %v1689_v33 = vadd.f32 %v4313_v8, %v1554_v19 }
 0x115   : > { %v1628_v34 = vadd.f32 %v4313_v8, %v1493_v24  ;;  %v1692_v29 = vadd.f32 %v4313_v8, %v1557_v25  ;;  %3649 = vst [vmem:[%s4338_s26 + $0x130] sm:$0xff] %v3485_v27   ;;  %v1626_v35 = vadd.f32 %v4313_v8, %v1491_v26  ;;  %v1555_v36 = vmul.f32 %v4308_v6, %v4398_v40  ;;  %v4460_v38 = vpop.f32.mrf.mxu0  ;;  %v4462_v39 = vpop.f32.mrf.mxu1 }
 0x116   : > { %v2075_v30 = vsel %vm1819_vm4, %v1691_v17, %v1947_v28  ;;  %v1496_v37 = vmul.f32 %v4405_v48, %v4308_v6  ;;  %vm1753_vm5 = vcmp.ge.f32.partialorder %v1625_v32, 0.0  ;;  %v1881_v41 = vmul.f32 0.1, %v1625_v32 }
 0x117   : > { %vm1817_vm6 = vcmp.ge.f32.partialorder %v1689_v33, 0.0  ;;  %v1945_v42 = vmul.f32 0.1, %v1689_v33  ;;  %vm1756_vm7 = vcmp.ge.f32.partialorder %v1628_v34, 0.0  ;;  %v1884_v43 = vmul.f32 0.1, %v1628_v34  ;;  %v4464_v45 = vpop.f32.mrf.mxu0  ;;  %v4466_v46 = vpop.f32.mrf.mxu1 }
 0x118   : > { %vm1820_vm8 = vcmp.ge.f32.partialorder %v1692_v29, 0.0  ;;  %v1948_v44 = vmul.f32 0.1, %v1692_v29  ;;  %v2009_v40 = vsel %vm1753_vm5, %v1625_v32, %v1881_v41  ;;  %vm1754_vm9 = vcmp.ge.f32.partialorder %v1626_v35, 0.0 }
 0x119   : > { %v2073_v47 = vsel %vm1817_vm6, %v1689_v33, %v1945_v42  ;;  %v1882_v48 = vmul.f32 0.1, %v1626_v35  ;;  %v2012_v50 = vsel %vm1756_vm7, %v1628_v34, %v1884_v43  ;;  %v1690_v52 = vadd.f32 %v4313_v8, %v1555_v36  ;;  %v4470_v54 = vpop.f32.mrf.mxu0  ;;  %v4472_v55 = vpop.f32.mrf.mxu1 }
 0x11a   : > { %v2076_v51 = vsel %vm1820_vm8, %v1692_v29, %v1948_v44  ;;  %v1631_v53 = vadd.f32 %v4313_v8, %v1496_v37  ;;  %v3340_v58 = vpack.c.bf16 %v2012_v50, %v2011_v21  ;;  %v1560_v61 = vmul.f32 %v4407_v49, %v4308_v6 }
 0x11b   : > { %v3500_v59 = vpack.c.bf16 %v2076_v51, %v2075_v30  ;;  %v2010_v60 = vsel %vm1754_vm9, %v1626_v35, %v1882_v48  ;;  %vm1818_vm10 = vcmp.ge.f32.partialorder %v1690_v52, 0.0  ;;  %v1946_v1 = vmul.f32 0.1, %v1690_v52  ;;  %v4476_v2 = vpop.f32.mrf.mxu0  ;;  %v4478_v3 = vpop.f32.mrf.mxu1 }
 0x11c   : > { %v3335_v62 = vpack.c.bf16 %v2010_v60, %v2009_v40  ;;  %vm1759_vm11 = vcmp.ge.f32.partialorder %v1631_v53, 0.0  ;;  %3620 = vst [vmem:[%s4338_s26 + $0x48] sm:$0xff] %v3340_v58   ;;  %v1887_v4 = vmul.f32 0.1, %v1631_v53  ;;  %v1695_v5 = vadd.f32 %v4313_v8, %v1560_v61 }
 0x11d   : > { %3652 = vst [vmem:[%s4338_s26 + $0x148] sm:$0xff] %v3500_v59   ;;  %v1494_v7 = vmul.f32 %v4308_v6, %v4413_v56  ;;  %v1558_v9 = vmul.f32 %v4308_v6, %v4415_v57  ;;  %v2074_v49 = vsel %vm1818_vm10, %v1690_v52, %v1946_v1  ;;  %v1497_v10 = vmul.f32 %v4417_v63, %v4308_v6  ;;  %v4494_v16 = vpop.f32.mrf.mxu0  ;;  %v4496_v17 = vpop.f32.mrf.mxu1 }
 0x11e   : > { %3619 = vst [vmem:[%s4338_s26 + $0x40] sm:$0xff] %v3335_v62   ;;  %v1561_v14 = vmul.f32 %v4419_v0, %v4308_v6  ;;  %v1495_v15 = vmul.f32 %v4308_v6, %v4425_v11  ;;  %v3495_v56 = vpack.c.bf16 %v2074_v49, %v2073_v47  ;;  %v2015_v18 = vsel %vm1759_vm11, %v1631_v53, %v1887_v4 }
 0x11f   : > { %vm1823_vm12 = vcmp.ge.f32.partialorder %v1695_v5, 0.0  ;;  %v1951_v57 = vmul.f32 0.1, %v1695_v5  ;;  %v1629_v19 = vadd.f32 %v4313_v8, %v1494_v7  ;;  %v1693_v23 = vadd.f32 %v4313_v8, %v1558_v9  ;;  %v4503_v24 = vpop.f32.mrf.mxu0  ;;  %v4505_v11 = vpop.f32.mrf.mxu1 }
 0x120   : > { %v1632_v63 = vadd.f32 %v4313_v8, %v1497_v10  ;;  %v1696_v0 = vadd.f32 %v4313_v8, %v1561_v14  ;;  %3651 = vst [vmem:[%s4338_s26 + $0x140] sm:$0xff] %v3495_v56   ;;  %v1630_v26 = vadd.f32 %v4313_v8, %v1495_v15  ;;  %v1559_v27 = vmul.f32 %v4308_v6, %v4427_v12 }
 0x121   : > { %v2079_v25 = vsel %vm1823_vm12, %v1695_v5, %v1951_v57  ;;  %v1500_v21 = vmul.f32 %v4436_v13, %v4308_v6  ;;  %vm1757_vm13 = vcmp.ge.f32.partialorder %v1629_v19, 0.0  ;;  %v1885_v28 = vmul.f32 0.1, %v1629_v19  ;;  %v4513_v33 = vpop.f32.mrf.mxu0  ;;  %v4515_v34 = vpop.f32.mrf.mxu1 }
 0x122   : > { %vm1821_vm14 = vcmp.ge.f32.partialorder %v1693_v23, 0.0  ;;  %v1949_v32 = vmul.f32 0.1, %v1693_v23  ;;  %vm1760_vm15 = vcmp.ge.f32.partialorder %v1632_v63, 0.0  ;;  %v1888_v29 = vmul.f32 0.1, %v1632_v63 }
 0x123   : > { %vm1824_vm0 = vcmp.ge.f32.partialorder %v1696_v0, 0.0  ;;  %v1952_v30 = vmul.f32 0.1, %v1696_v0  ;;  %v2013_v35 = vsel %vm1757_vm13, %v1629_v19, %v1885_v28  ;;  %vm1758_vm1 = vcmp.ge.f32.partialorder %v1630_v26, 0.0  ;;  %v4517_v12 = vpop.f32.mrf.mxu0  ;;  %v4519_v13 = vpop.f32.mrf.mxu1 }
 0x124   : > { %v2077_v36 = vsel %vm1821_vm14, %v1693_v23, %v1949_v32  ;;  %v1886_v37 = vmul.f32 0.1, %v1630_v26  ;;  %v2016_v41 = vsel %vm1760_vm15, %v1632_v63, %v1888_v29  ;;  %v1694_v43 = vadd.f32 %v4313_v8, %v1559_v27 }
 0x125   : > { %v2080_v42 = vsel %vm1824_vm0, %v1696_v0, %v1952_v30  ;;  %v1635_v44 = vadd.f32 %v4313_v8, %v1500_v21  ;;  %v3350_v40 = vpack.c.bf16 %v2016_v41, %v2015_v18  ;;  %v1564_v50 = vmul.f32 %v4438_v20, %v4308_v6  ;;  %v4525_v51 = vpop.f32.mrf.mxu0  ;;  %v4527_v52 = vpop.f32.mrf.mxu1 }
 0x126   : > { %v3510_v47 = vpack.c.bf16 %v2080_v42, %v2079_v25  ;;  %v2014_v48 = vsel %vm1758_vm1, %v1630_v26, %v1886_v37  ;;  %vm1822_vm2 = vcmp.ge.f32.partialorder %v1694_v43, 0.0  ;;  %v1950_v58 = vmul.f32 0.1, %v1694_v43 }
 0x127   : > { %v3345_v53 = vpack.c.bf16 %v2014_v48, %v2013_v35  ;;  %vm1763_vm3 = vcmp.ge.f32.partialorder %v1635_v44, 0.0  ;;  %3622 = vst [vmem:[%s4338_s26 + $0x58] sm:$0xff] %v3350_v40   ;;  %v1891_v59 = vmul.f32 0.1, %v1635_v44  ;;  %v1699_v60 = vadd.f32 %v4313_v8, %v1564_v50  ;;  %v4536_v20 = vpop.f32.mrf.mxu0  ;;  %v4538_v1 = vpop.f32.mrf.mxu1 }
 0x128   : > { %3654 = vst [vmem:[%s4338_s26 + $0x158] sm:$0xff] %v3510_v47   ;;  %v1498_v61 = vmul.f32 %v4308_v6, %v4446_v22  ;;  %v1562_v62 = vmul.f32 %v4308_v6, %v4448_v31  ;;  %v2078_v4 = vsel %vm1822_vm2, %v1694_v43, %v1950_v58  ;;  %v1501_v5 = vmul.f32 %v4460_v38, %v4308_v6 }
 0x129   : > { %3621 = vst [vmem:[%s4338_s26 + $0x50] sm:$0xff] %v3345_v53   ;;  %v1565_v7 = vmul.f32 %v4462_v39, %v4308_v6  ;;  %v1499_v9 = vmul.f32 %v4308_v6, %v4464_v45  ;;  %v3505_v22 = vpack.c.bf16 %v2078_v4, %v2077_v36  ;;  %v2019_v49 = vsel %vm1763_vm3, %v1635_v44, %v1891_v59  ;;  %v4547_v10 = vpop.f32.mrf.mxu0  ;;  %v4549_v14 = vpop.f32.mrf.mxu1 }
 0x12a   : > { %vm1827_vm4 = vcmp.ge.f32.partialorder %v1699_v60, 0.0  ;;  %v1955_v31 = vmul.f32 0.1, %v1699_v60  ;;  %v1633_v15 = vadd.f32 %v4313_v8, %v1498_v61  ;;  %v1697_v56 = vadd.f32 %v4313_v8, %v1562_v62 }
 0x12b   : > { %v1636_v38 = vadd.f32 %v4313_v8, %v1501_v5  ;;  %v1700_v18 = vadd.f32 %v4313_v8, %v1565_v7  ;;  %3653 = vst [vmem:[%s4338_s26 + $0x150] sm:$0xff] %v3505_v22   ;;  %v1634_v45 = vadd.f32 %v4313_v8, %v1499_v9  ;;  %v1563_v57 = vmul.f32 %v4308_v6, %v4466_v46  ;;  %v4561_v23 = vpop.f32.mrf.mxu0  ;;  %v4563_v63 = vpop.f32.mrf.mxu1 }
 0x12c   : > { %v2083_v39 = vsel %vm1827_vm4, %v1699_v60, %v1955_v31  ;;  %v1504_v19 = vmul.f32 %v4470_v54, %v4308_v6  ;;  %vm1761_vm5 = vcmp.ge.f32.partialorder %v1633_v15, 0.0  ;;  %v1889_v0 = vmul.f32 0.1, %v1633_v15 }
 0x12d   : > { %vm1825_vm6 = vcmp.ge.f32.partialorder %v1697_v56, 0.0  ;;  %v1953_v25 = vmul.f32 0.1, %v1697_v56  ;;  %vm1764_vm7 = vcmp.ge.f32.partialorder %v1636_v38, 0.0  ;;  %v1892_v26 = vmul.f32 0.1, %v1636_v38  ;;  %v4565_v21 = vpop.f32.mrf.mxu0  ;;  %v4567_v28 = vpop.f32.mrf.mxu1 }
 0x12e   : > { %vm1828_vm8 = vcmp.ge.f32.partialorder %v1700_v18, 0.0  ;;  %v1956_v27 = vmul.f32 0.1, %v1700_v18  ;;  %v2017_v46 = vsel %vm1761_vm5, %v1633_v15, %v1889_v0  ;;  %vm1762_vm9 = vcmp.ge.f32.partialorder %v1634_v45, 0.0 }
 0x12f   : > { %v2081_v32 = vsel %vm1825_vm6, %v1697_v56, %v1953_v25  ;;  %v1890_v54 = vmul.f32 0.1, %v1634_v45  ;;  %v2020_v29 = vsel %vm1764_vm7, %v1636_v38, %v1892_v26  ;;  %v1698_v35 = vadd.f32 %v4313_v8, %v1563_v57  ;;  %v4571_v37 = vpop.f32.mrf.mxu0  ;;  %v4573_v41 = vpop.f32.mrf.mxu1 }
 0x130   : > { %v2084_v30 = vsel %vm1828_vm8, %v1700_v18, %v1956_v27  ;;  %v1639_v36 = vadd.f32 %v4313_v8, %v1504_v19  ;;  %v3360_v42 = vpack.c.bf16 %v2020_v29, %v2019_v49  ;;  %v1568_v40 = vmul.f32 %v4472_v55, %v4308_v6 }
 0x131   : > { %v3520_v43 = vpack.c.bf16 %v2084_v30, %v2083_v39  ;;  %v2018_v44 = vsel %vm1762_vm9, %v1634_v45, %v1890_v54  ;;  %vm1826_vm10 = vcmp.ge.f32.partialorder %v1698_v35, 0.0  ;;  %v1954_v48 = vmul.f32 0.1, %v1698_v35  ;;  %v4577_v50 = vpop.f32.mrf.mxu0  ;;  %v4579_v53 = vpop.f32.mrf.mxu1 }
 0x132   : > { %v3355_v47 = vpack.c.bf16 %v2018_v44, %v2017_v46  ;;  %vm1767_vm11 = vcmp.ge.f32.partialorder %v1639_v36, 0.0  ;;  %3624 = vst [vmem:[%s4338_s26 + $0x68] sm:$0xff] %v3360_v42   ;;  %v1895_v58 = vmul.f32 0.1, %v1639_v36  ;;  %v1703_v59 = vadd.f32 %v4313_v8, %v1568_v40 }
 0x133   : > { %3656 = vst [vmem:[%s4338_s26 + $0x168] sm:$0xff] %v3520_v43   ;;  %v1502_v60 = vmul.f32 %v4308_v6, %v4476_v2  ;;  %v1566_v61 = vmul.f32 %v4308_v6, %v4478_v3  ;;  %v2082_v55 = vsel %vm1826_vm10, %v1698_v35, %v1954_v48  ;;  %v1505_v62 = vmul.f32 %v4494_v16, %v4308_v6  ;;  %v4595_v7 = vpop.f32.mrf.mxu0  ;;  %v4597_v9 = vpop.f32.mrf.mxu1 }
 0x134   : > { %3623 = vst [vmem:[%s4338_s26 + $0x60] sm:$0xff] %v3355_v47   ;;  %v1569_v4 = vmul.f32 %v4496_v17, %v4308_v6  ;;  %v1503_v5 = vmul.f32 %v4308_v6, %v4503_v24  ;;  %v3515_v2 = vpack.c.bf16 %v2082_v55, %v2081_v32  ;;  %v2023_v22 = vsel %vm1767_vm11, %v1639_v36, %v1895_v58 }
 0x135   : > { %vm1831_vm12 = vcmp.ge.f32.partialorder %v1703_v59, 0.0  ;;  %v1959_v3 = vmul.f32 0.1, %v1703_v59  ;;  %v1637_v49 = vadd.f32 %v4313_v8, %v1502_v60  ;;  %v1701_v31 = vadd.f32 %v4313_v8, %v1566_v61  ;;  %v4604_v15 = vpop.f32.mrf.mxu0  ;;  %v4612_v57 = vpop.f32.mrf.mxu1 }
 0x136   : > { %v1640_v16 = vadd.f32 %v4313_v8, %v1505_v62  ;;  %v1704_v17 = vadd.f32 %v4313_v8, %v1569_v4  ;;  %3655 = vst [vmem:[%s4338_s26 + $0x160] sm:$0xff] %v3515_v2   ;;  %v1638_v56 = vadd.f32 %v4313_v8, %v1503_v5  ;;  %v1567_v38 = vmul.f32 %v4308_v6, %v4505_v11 }
 0x137   : > { %v2087_v24 = vsel %vm1831_vm12, %v1703_v59, %v1959_v3  ;;  %v1508_v18 = vmul.f32 %v4513_v33, %v4308_v6  ;;  %vm1765_vm13 = vcmp.ge.f32.partialorder %v1637_v49, 0.0  ;;  %v1893_v39 = vmul.f32 0.1, %v1637_v49  ;;  %v4614_v25 = vpop.f32.mrf.mxu0  ;;  %v4620_v42 = vpop.f32.mrf.mxu1 }
 0x138   : > { %vm1829_vm14 = vcmp.ge.f32.partialorder %v1701_v31, 0.0  ;;  %v1957_v45 = vmul.f32 0.1, %v1701_v31  ;;  %vm1768_vm15 = vcmp.ge.f32.partialorder %v1640_v16, 0.0  ;;  %v1896_v19 = vmul.f32 0.1, %v1640_v16 }
 0x139   : > { %vm1832_vm0 = vcmp.ge.f32.partialorder %v1704_v17, 0.0  ;;  %v1960_v0 = vmul.f32 0.1, %v1704_v17  ;;  %v2021_v26 = vsel %vm1765_vm13, %v1637_v49, %v1893_v39  ;;  %vm1766_vm1 = vcmp.ge.f32.partialorder %v1638_v56, 0.0  ;;  %v4622_v40 = vpop.f32.mrf.mxu0 }
 0x13a   : > { %v2085_v27 = vsel %vm1829_vm14, %v1701_v31, %v1957_v45  ;;  %v1894_v11 = vmul.f32 0.1, %v1638_v56  ;;  %v2024_v46 = vsel %vm1768_vm15, %v1640_v16, %v1896_v19  ;;  %v1702_v32 = vadd.f32 %v4313_v8, %v1567_v38 }
 0x13b   : > { %v2088_v33 = vsel %vm1832_vm0, %v1704_v17, %v1960_v0  ;;  %v1643_v54 = vadd.f32 %v4313_v8, %v1508_v18  ;;  %v3370_v29 = vpack.c.bf16 %v2024_v46, %v2023_v22  ;;  %v1572_v36 = vmul.f32 %v4515_v34, %v4308_v6  ;;  %v4644_v3 = vpop.f32.mrf.mxu0  ;;  %v4666_v46 = vld [vmem:[%s4950_s2] ss:$0 sm:$0xff] }
 0x13c   : > { %v3530_v30 = vpack.c.bf16 %v2088_v33, %v2087_v24  ;;  %v2022_v35 = vsel %vm1766_vm1, %v1638_v56, %v1894_v11  ;;  %vm1830_vm2 = vcmp.ge.f32.partialorder %v1702_v32, 0.0  ;;  %v1958_v44 = vmul.f32 0.1, %v1702_v32 }
 0x13d   : > { %v3365_v43 = vpack.c.bf16 %v2022_v35, %v2021_v26  ;;  %vm1771_vm3 = vcmp.ge.f32.partialorder %v1643_v54, 0.0  ;;  %3626 = vst [vmem:[%s4338_s26 + $0x78] sm:$0xff] %v3370_v29   ;;  %v1899_v47 = vmul.f32 0.1, %v1643_v54  ;;  %v1707_v48 = vadd.f32 %v4313_v8, %v1572_v36  ;;  %v4654_v45 = vpop.f32.mrf.mxu0 }
 0x13e   : > { %3658 = vst [vmem:[%s4338_s26 + $0x178] sm:$0xff] %v3530_v30   ;;  %v1506_v58 = vmul.f32 %v4308_v6, %v4517_v12  ;;  %v1570_v59 = vmul.f32 %v4308_v6, %v4519_v13  ;;  %v2086_v34 = vsel %vm1830_vm2, %v1702_v32, %v1958_v44  ;;  %v1509_v60 = vmul.f32 %v4525_v51, %v4308_v6  ;;  %v4638_v12 = vpop.f32.mrf.mxu1 }
 0x13f   : > { %3625 = vst [vmem:[%s4338_s26 + $0x70] sm:$0xff] %v3365_v43   ;;  %v1573_v61 = vmul.f32 %v4527_v52, %v4308_v6  ;;  %v1507_v55 = vmul.f32 %v4308_v6, %v4536_v20  ;;  %v3525_v62 = vpack.c.bf16 %v2086_v34, %v2085_v27  ;;  %v2027_v4 = vsel %vm1771_vm3, %v1643_v54, %v1899_v47  ;;  %v4679_v44 = vpop.f32.mrf.mxu0 }
 0x140   : > { %vm1835_vm4 = vcmp.ge.f32.partialorder %v1707_v48, 0.0  ;;  %v1963_v5 = vmul.f32 0.1, %v1707_v48  ;;  %v1641_v13 = vadd.f32 %v4313_v8, %v1506_v58  ;;  %v1705_v2 = vadd.f32 %v4313_v8, %v1570_v59  ;;  %v4652_v38 = vpop.f32.mrf.mxu1 }
 0x141   : > { %v1644_v22 = vadd.f32 %v4313_v8, %v1509_v60  ;;  %v1708_v51 = vadd.f32 %v4313_v8, %v1573_v61  ;;  %3657 = vst [vmem:[%s4338_s26 + $0x170] sm:$0xff] %v3525_v62   ;;  %v1642_v20 = vadd.f32 %v4313_v8, %v1507_v55  ;;  %v1571_v49 = vmul.f32 %v4308_v6, %v4538_v1 }
 0x142   : > { %v2091_v52 = vsel %vm1835_vm4, %v1707_v48, %v1963_v5  ;;  %v1512_v31 = vmul.f32 %v4547_v10, %v4308_v6  ;;  %vm1769_vm5 = vcmp.ge.f32.partialorder %v1641_v13, 0.0  ;;  %v1897_v16 = vmul.f32 0.1, %v1641_v13  ;;  %v4659_v10 = vld [vmem:[%s4951_s3] ss:$0 sm:$0xff]  ;;  %v4670_v29 = vpop.f32.mrf.mxu1  ;;  %v4700_v5 = vpop.f32.mrf.mxu0 }
 0x143   : > { %vm1833_vm6 = vcmp.ge.f32.partialorder %v1705_v2, 0.0  ;;  %v1961_v17 = vmul.f32 0.1, %v1705_v2  ;;  %vm1772_vm7 = vcmp.ge.f32.partialorder %v1644_v22, 0.0  ;;  %v1900_v24 = vmul.f32 0.1, %v1644_v22 }
 0x144   : > { %vm1836_vm8 = vcmp.ge.f32.partialorder %v1708_v51, 0.0  ;;  %v1964_v56 = vmul.f32 0.1, %v1708_v51  ;;  %v2025_v18 = vsel %vm1769_vm5, %v1641_v13, %v1897_v16  ;;  %vm1770_vm9 = vcmp.ge.f32.partialorder %v1642_v20, 0.0  ;;  %v4692_v62 = vpop.f32.mrf.mxu1 }
 0x145   : > { %v2089_v39 = vsel %vm1833_vm6, %v1705_v2, %v1961_v17  ;;  %v1898_v8 = vmul.f32 0.1, %v1642_v20  ;;  %v2028_v1 = vsel %vm1772_vm7, %v1644_v22, %v1900_v24  ;;  %v1706_v19 = vadd.f32 %v4659_v10, %v1571_v49  ;;  %v4706_v24 = vpop.f32.mrf.mxu0 }
 0x146   : > { %v2092_v6 = vsel %vm1836_vm8, %v1708_v51, %v1964_v56  ;;  %v1647_v0 = vadd.f32 %v4659_v10, %v1512_v31  ;;  %v3380_v26 = vpack.c.bf16 %v2028_v1, %v2027_v4  ;;  %v1576_v33 = vmul.f32 %v4666_v46, %v4549_v14 }
 0x147   : > { %v3540_v27 = vpack.c.bf16 %v2092_v6, %v2091_v52  ;;  %v2026_v11 = vsel %vm1770_vm9, %v1642_v20, %v1898_v8  ;;  %vm1834_vm10 = vcmp.ge.f32.partialorder %v1706_v19, 0.0  ;;  %v1962_v54 = vmul.f32 0.1, %v1706_v19 }
 0x148   : > { %v3375_v32 = vpack.c.bf16 %v2026_v11, %v2025_v18  ;;  %vm1775_vm11 = vcmp.ge.f32.partialorder %v1647_v0, 0.0  ;;  %3628 = vst [vmem:[%s4338_s26 + $0x88] sm:$0xff] %v3380_v26   ;;  %v1903_v30 = vmul.f32 0.1, %v1647_v0  ;;  %v1711_v35 = vadd.f32 %v4659_v10, %v1576_v33 }
 0x149   : > { %3660 = vst [vmem:[%s4338_s26 + $0x188] sm:$0xff] %v3540_v27   ;;  %v1510_v36 = vmul.f32 %v4666_v46, %v4561_v23  ;;  %v1574_v43 = vmul.f32 %v4666_v46, %v4563_v63  ;;  %v2090_v14 = vsel %vm1834_vm10, %v1706_v19, %v1962_v54  ;;  %v1513_v47 = vmul.f32 %v4666_v46, %v4565_v21 }
 0x14a   : > { %3627 = vst [vmem:[%s4338_s26 + $0x80] sm:$0xff] %v3375_v32   ;;  %v1577_v48 = vmul.f32 %v4666_v46, %v4567_v28  ;;  %v1511_v58 = vmul.f32 %v4666_v46, %v4571_v37  ;;  %v3535_v59 = vpack.c.bf16 %v2090_v14, %v2089_v39  ;;  %v2031_v34 = vsel %vm1775_vm11, %v1647_v0, %v1903_v30  ;;  %v4726_v30 = vpop.f32.mrf.mxu0 }
 0x14b   : > { %vm1839_vm12 = vcmp.ge.f32.partialorder %v1711_v35, 0.0  ;;  %v1967_v23 = vmul.f32 0.1, %v1711_v35  ;;  %v1645_v63 = vadd.f32 %v4659_v10, %v1510_v36  ;;  %v1709_v60 = vadd.f32 %v4659_v10, %v1574_v43 }
 0x14c   : > { %v1648_v61 = vadd.f32 %v4659_v10, %v1513_v47  ;;  %v1712_v55 = vadd.f32 %v4659_v10, %v1577_v48  ;;  %3659 = vst [vmem:[%s4338_s26 + $0x180] sm:$0xff] %v3535_v59   ;;  %v1646_v28 = vadd.f32 %v4659_v10, %v1511_v58  ;;  %v1575_v37 = vmul.f32 %v4666_v46, %v4573_v41  ;;  %v4702_v41 = vpop.f32.mrf.mxu1 }
 0x14d   : > { %v2095_v21 = vsel %vm1839_vm12, %v1711_v35, %v1967_v23  ;;  %v1516_v4 = vmul.f32 %v4666_v46, %v4577_v50  ;;  %vm1773_vm13 = vcmp.ge.f32.partialorder %v1645_v63, 0.0  ;;  %v1901_v13 = vmul.f32 0.1, %v1645_v63  ;;  %v4740_v23 = vpop.f32.mrf.mxu0 }
 0x14e   : > { %vm1837_vm14 = vcmp.ge.f32.partialorder %v1709_v60, 0.0  ;;  %v1965_v2 = vmul.f32 0.1, %v1709_v60  ;;  %vm1776_vm15 = vcmp.ge.f32.partialorder %v1648_v61, 0.0  ;;  %v1904_v22 = vmul.f32 0.1, %v1648_v61  ;;  %v4717_v11 = vpop.f32.mrf.mxu1 }
 0x14f   : > { %vm1840_vm0 = vcmp.ge.f32.partialorder %v1712_v55, 0.0  ;;  %v1968_v51 = vmul.f32 0.1, %v1712_v55  ;;  %v2029_v52 = vsel %vm1773_vm13, %v1645_v63, %v1901_v13  ;;  %vm1774_vm1 = vcmp.ge.f32.partialorder %v1646_v28, 0.0 }
 0x150   : > { %v2093_v20 = vsel %vm1837_vm14, %v1709_v60, %v1965_v2  ;;  %v1902_v49 = vmul.f32 0.1, %v1646_v28  ;;  %v2032_v31 = vsel %vm1776_vm15, %v1648_v61, %v1904_v22  ;;  %v1710_v16 = vadd.f32 %v4659_v10, %v1575_v37  ;;  %v4738_v58 = vpop.f32.mrf.mxu1 }
 0x151   : > { %v2096_v50 = vsel %vm1840_vm0, %v1712_v55, %v1968_v51  ;;  %v1651_v17 = vadd.f32 %v4659_v10, %v1516_v4  ;;  %v3390_v56 = vpack.c.bf16 %v2032_v31, %v2031_v34  ;;  %v1580_v8 = vmul.f32 %v4666_v46, %v4579_v53 }
 0x152   : > { %v3550_v18 = vpack.c.bf16 %v2096_v50, %v2095_v21  ;;  %v2030_v39 = vsel %vm1774_vm1, %v1646_v28, %v1902_v49  ;;  %vm1838_vm2 = vcmp.ge.f32.partialorder %v1710_v16, 0.0  ;;  %v1966_v6 = vmul.f32 0.1, %v1710_v16  ;;  %v4744_v4 = vpop.f32.mrf.mxu1 }
 0x153   : > { %v3385_v1 = vpack.c.bf16 %v2030_v39, %v2029_v52  ;;  %vm1779_vm3 = vcmp.ge.f32.partialorder %v1651_v17, 0.0  ;;  %3630 = vst [vmem:[%s4338_s26 + $0x98] sm:$0xff] %v3390_v56   ;;  %v1907_v19 = vmul.f32 0.1, %v1651_v17  ;;  %v1715_v0 = vadd.f32 %v4659_v10, %v1580_v8  ;;  %v4748_v52 = vpop.f32.mrf.mxu0 }
 0x154   : > { %3662 = vst [vmem:[%s4338_s26 + $0x198] sm:$0xff] %v3550_v18   ;;  %v1514_v26 = vmul.f32 %v4666_v46, %v4595_v7  ;;  %v1578_v27 = vmul.f32 %v4666_v46, %v4597_v9  ;;  %v2094_v53 = vsel %vm1838_vm2, %v1710_v16, %v1966_v6  ;;  %v1517_v33 = vmul.f32 %v4666_v46, %v4604_v15  ;;  %v4764_v8 = vpop.f32.mrf.mxu1 }
 0x155   : > { %3629 = vst [vmem:[%s4338_s26 + $0x90] sm:$0xff] %v3385_v1   ;;  %v1581_v32 = vmul.f32 %v4666_v46, %v4612_v57  ;;  %v1515_v54 = vmul.f32 %v4666_v46, %v4614_v25  ;;  %v3545_v7 = vpack.c.bf16 %v2094_v53, %v2093_v20  ;;  %v2035_v35 = vsel %vm1779_vm3, %v1651_v17, %v1907_v19  ;;  %v4766_v19 = vpop.f32.mrf.mxu0 }
 0x156   : > { %vm1843_vm4 = vcmp.ge.f32.partialorder %v1715_v0, 0.0  ;;  %v1971_v9 = vmul.f32 0.1, %v1715_v0  ;;  %v1649_v36 = vadd.f32 %v4659_v10, %v1514_v26  ;;  %v1713_v43 = vadd.f32 %v4659_v10, %v1578_v27 }
 0x157   : > { %v1652_v14 = vadd.f32 %v4659_v10, %v1517_v33  ;;  %v1716_v15 = vadd.f32 %v4659_v10, %v1581_v32  ;;  %3661 = vst [vmem:[%s4338_s26 + $0x190] sm:$0xff] %v3545_v7   ;;  %v1650_v57 = vadd.f32 %v4659_v10, %v1515_v54  ;;  %v1579_v25 = vmul.f32 %v4666_v46, %v4620_v42  ;;  %v4778_v54 = vpop.f32.mrf.mxu1 }
 0x158   : > { %v2099_v47 = vsel %vm1843_vm4, %v1715_v0, %v1971_v9  ;;  %v1520_v48 = vmul.f32 %v4666_v46, %v4622_v40  ;;  %vm1777_vm5 = vcmp.ge.f32.partialorder %v1649_v36, 0.0  ;;  %v1905_v59 = vmul.f32 0.1, %v1649_v36  ;;  %v4780_v9 = vpop.f32.mrf.mxu0 }
 0x159   : > { %vm1841_vm6 = vcmp.ge.f32.partialorder %v1713_v43, 0.0  ;;  %v1969_v34 = vmul.f32 0.1, %v1713_v43  ;;  %vm1780_vm7 = vcmp.ge.f32.partialorder %v1652_v14, 0.0  ;;  %v1908_v63 = vmul.f32 0.1, %v1652_v14 }
 0x15a   : > { %vm1844_vm8 = vcmp.ge.f32.partialorder %v1716_v15, 0.0  ;;  %v1972_v60 = vmul.f32 0.1, %v1716_v15  ;;  %v2033_v61 = vsel %vm1777_vm5, %v1649_v36, %v1905_v59  ;;  %vm1778_vm9 = vcmp.ge.f32.partialorder %v1650_v57, 0.0 }
 0x15b   : > { %v2097_v55 = vsel %vm1841_vm6, %v1713_v43, %v1969_v34  ;;  %v1906_v42 = vmul.f32 0.1, %v1650_v57  ;;  %v2036_v21 = vsel %vm1780_vm7, %v1652_v14, %v1908_v63  ;;  %v1714_v28 = vadd.f32 %v4659_v10, %v1579_v25  ;;  %v4786_v34 = vpop.f32.mrf.mxu1 }
 0x15c   : > { %v2100_v40 = vsel %vm1844_vm8, %v1716_v15, %v1972_v60  ;;  %v1655_v37 = vadd.f32 %v4659_v10, %v1520_v48  ;;  %v3400_v13 = vpack.c.bf16 %v2036_v21, %v2035_v35  ;;  %v1584_v51 = vmul.f32 %v4666_v46, %v4638_v12 }
 0x15d   : > { %v3560_v2 = vpack.c.bf16 %v2100_v40, %v2099_v47  ;;  %v2034_v22 = vsel %vm1778_vm9, %v1650_v57, %v1906_v42  ;;  %vm1842_vm10 = vcmp.ge.f32.partialorder %v1714_v28, 0.0  ;;  %v1970_v49 = vmul.f32 0.1, %v1714_v28 }
 0x15e   : > { %v3395_v20 = vpack.c.bf16 %v2034_v22, %v2033_v61  ;;  %vm1783_vm11 = vcmp.ge.f32.partialorder %v1655_v37, 0.0  ;;  %3632 = vst [vmem:[%s4338_s26 + $0xa8] sm:$0xff] %v3400_v13   ;;  %v1911_v31 = vmul.f32 0.1, %v1655_v37  ;;  %v1719_v50 = vadd.f32 %v4659_v10, %v1584_v51  ;;  %v4788_v61 = vpop.f32.mrf.mxu0 }
 0x15f   : > { %3664 = vst [vmem:[%s4338_s26 + $0x1a8] sm:$0xff] %v3560_v2   ;;  %v1518_v16 = vmul.f32 %v4666_v46, %v4644_v3  ;;  %v1582_v17 = vmul.f32 %v4666_v46, %v4652_v38  ;;  %v2098_v12 = vsel %vm1842_vm10, %v1714_v28, %v1970_v49  ;;  %v1521_v56 = vmul.f32 %v4666_v46, %v4654_v45 }
 0x160   : > { %3631 = vst [vmem:[%s4338_s26 + $0xa0] sm:$0xff] %v3395_v20   ;;  %v1585_v18 = vmul.f32 %v4666_v46, %v4670_v29  ;;  %v1519_v39 = vmul.f32 %v4666_v46, %v4679_v44  ;;  %v3555_v1 = vpack.c.bf16 %v2098_v12, %v2097_v55  ;;  %v2039_v6 = vsel %vm1783_vm11, %v1655_v37, %v1911_v31 }
 0x161   : > { %vm1847_vm12 = vcmp.ge.f32.partialorder %v1719_v50, 0.0  ;;  %v1975_v3 = vmul.f32 0.1, %v1719_v50  ;;  %v1653_v38 = vadd.f32 %v4659_v10, %v1518_v16  ;;  %v1717_v0 = vadd.f32 %v4659_v10, %v1582_v17 }
 0x162   : > { %v1656_v45 = vadd.f32 %v4659_v10, %v1521_v56  ;;  %v1720_v26 = vadd.f32 %v4659_v10, %v1585_v18  ;;  %3663 = vst [vmem:[%s4338_s26 + $0x1a0] sm:$0xff] %v3555_v1   ;;  %v1654_v44 = vadd.f32 %v4659_v10, %v1519_v39  ;;  %v1583_v27 = vmul.f32 %v4666_v46, %v4692_v62 }
 0x163   : > { %v2103_v29 = vsel %vm1847_vm12, %v1719_v50, %v1975_v3  ;;  %v1524_v53 = vmul.f32 %v4666_v46, %v4700_v5  ;;  %vm1781_vm13 = vcmp.ge.f32.partialorder %v1653_v38, 0.0  ;;  %v1909_v33 = vmul.f32 0.1, %v1653_v38 }
 0x164   : > { %vm1845_vm14 = vcmp.ge.f32.partialorder %v1717_v0, 0.0  ;;  %v1973_v32 = vmul.f32 0.1, %v1717_v0  ;;  %vm1784_vm15 = vcmp.ge.f32.partialorder %v1656_v45, 0.0  ;;  %v1912_v7 = vmul.f32 0.1, %v1656_v45 }
 0x165   : > { %vm1848_vm0 = vcmp.ge.f32.partialorder %v1720_v26, 0.0  ;;  %v1976_v35 = vmul.f32 0.1, %v1720_v26  ;;  %v2037_v36 = vsel %vm1781_vm13, %v1653_v38, %v1909_v33  ;;  %vm1782_vm1 = vcmp.ge.f32.partialorder %v1654_v44, 0.0 }
 0x166   : > { %v2101_v43 = vsel %vm1845_vm14, %v1717_v0, %v1973_v32  ;;  %v1910_v62 = vmul.f32 0.1, %v1654_v44  ;;  %v2040_v14 = vsel %vm1784_vm15, %v1656_v45, %v1912_v7  ;;  %v1718_v15 = vadd.f32 %v4659_v10, %v1583_v27 }
 0x167   : > { %v2104_v5 = vsel %vm1848_vm0, %v1720_v26, %v1976_v35  ;;  %v1659_v47 = vadd.f32 %v4659_v10, %v1524_v53  ;;  %v3410_v57 = vpack.c.bf16 %v2040_v14, %v2039_v6  ;;  %v1588_v59 = vmul.f32 %v4666_v46, %v4702_v41 }
 0x168   : > { %v3570_v25 = vpack.c.bf16 %v2104_v5, %v2103_v29  ;;  %v2038_v48 = vsel %vm1782_vm1, %v1654_v44, %v1910_v62  ;;  %vm1846_vm2 = vcmp.ge.f32.partialorder %v1718_v15, 0.0  ;;  %v1974_v60 = vmul.f32 0.1, %v1718_v15 }
 0x169   : > { %v3405_v63 = vpack.c.bf16 %v2038_v48, %v2037_v36  ;;  %vm1787_vm3 = vcmp.ge.f32.partialorder %v1659_v47, 0.0  ;;  %3634 = vst [vmem:[%s4338_s26 + $0xb8] sm:$0xff] %v3410_v57   ;;  %v1915_v55 = vmul.f32 0.1, %v1659_v47  ;;  %v1723_v42 = vadd.f32 %v4659_v10, %v1588_v59 }
 0x16a   : > { %3666 = vst [vmem:[%s4338_s26 + $0x1b8] sm:$0xff] %v3570_v25   ;;  %v1522_v21 = vmul.f32 %v4666_v46, %v4706_v24  ;;  %v1586_v40 = vmul.f32 %v4666_v46, %v4717_v11  ;;  %v2102_v41 = vsel %vm1846_vm2, %v1718_v15, %v1974_v60  ;;  %v1525_v28 = vmul.f32 %v4666_v46, %v4726_v30  ;;  %v1423_v24 = vpop.f32.mrf.mxu1  ;;  %v3803_v30 = vpop.f32.mrf.mxu0 }
 0x16b   : > { %3633 = vst [vmem:[%s4338_s26 + $0xb0] sm:$0xff] %v3405_v63   ;;  %v1589_v37 = vmul.f32 %v4666_v46, %v4738_v58  ;;  %v1523_v13 = vmul.f32 %v4666_v46, %v4740_v23  ;;  %v3565_v2 = vpack.c.bf16 %v2102_v41, %v2101_v43  ;;  %v2043_v22 = vsel %vm1787_vm3, %v1659_v47, %v1915_v55 }
 0x16c   : > { %vm1851_vm4 = vcmp.ge.f32.partialorder %v1723_v42, 0.0  ;;  %v1979_v51 = vmul.f32 0.1, %v1723_v42  ;;  %v1657_v20 = vadd.f32 %v4659_v10, %v1522_v21  ;;  %v1721_v11 = vadd.f32 %v4659_v10, %v1586_v40  ;;  %v4814_v39 = vpop.f32.mrf.mxu1 }
 0x16d   : > { %v1660_v49 = vadd.f32 %v4659_v10, %v1525_v28  ;;  %v1724_v31 = vadd.f32 %v4659_v10, %v1589_v37  ;;  %3665 = vst [vmem:[%s4338_s26 + $0x1b0] sm:$0xff] %v3565_v2   ;;  %v1658_v58 = vadd.f32 %v4659_v10, %v1523_v13  ;;  %v1587_v23 = vmul.f32 %v4666_v46, %v4744_v4  ;;  %v4816_v4 = vpop.f32.mrf.mxu0 }
 0x16e   : > { %v2107_v50 = vsel %vm1851_vm4, %v1723_v42, %v1979_v51  ;;  %v1528_v16 = vmul.f32 %v4666_v46, %v4748_v52  ;;  %vm1785_vm5 = vcmp.ge.f32.partialorder %v1657_v20, 0.0  ;;  %v1913_v17 = vmul.f32 0.1, %v1657_v20  ;;  %v1436_v32 = vpop.f32.mrf.mxu1 }
 0x16f   : > { %vm1849_vm6 = vcmp.ge.f32.partialorder %v1721_v11, 0.0  ;;  %v1977_v12 = vmul.f32 0.1, %v1721_v11  ;;  %vm1788_vm7 = vcmp.ge.f32.partialorder %v1660_v49, 0.0  ;;  %v1916_v56 = vmul.f32 0.1, %v1660_v49  ;;  %v3804_v62 = vpop.f32.mrf.mxu0 }
 0x170   : > { %vm1852_vm8 = vcmp.ge.f32.partialorder %v1724_v31, 0.0  ;;  %v1980_v18 = vmul.f32 0.1, %v1724_v31  ;;  %v2041_v1 = vsel %vm1785_vm5, %v1657_v20, %v1913_v17  ;;  %vm1786_vm9 = vcmp.ge.f32.partialorder %v1658_v58, 0.0  ;;  %v3868_v63 = vpop.f32.mrf.mxu1 }
 0x171   : > { %v2105_v6 = vsel %vm1849_vm6, %v1721_v11, %v1977_v12  ;;  %v1914_v3 = vmul.f32 0.1, %v1658_v58  ;;  %v2044_v38 = vsel %vm1788_vm7, %v1660_v49, %v1916_v56  ;;  %v1722_v0 = vadd.f32 %v4659_v10, %v1587_v23  ;;  %v1183_v55 = vpop.f32.mrf.mxu0 }
 0x172   : > { %v2108_v52 = vsel %vm1852_vm8, %v1724_v31, %v1980_v18  ;;  %v1663_v45 = vadd.f32 %v4659_v10, %v1528_v16  ;;  %v3420_v26 = vpack.c.bf16 %v2044_v38, %v2043_v22  ;;  %v1592_v27 = vmul.f32 %v4666_v46, %v4764_v8  ;;  %v1439_v2 = vpop.f32.mrf.mxu1 }
 0x173   : > { %v3580_v29 = vpack.c.bf16 %v2108_v52, %v2107_v50  ;;  %v2042_v44 = vsel %vm1786_vm9, %v1658_v58, %v1914_v3  ;;  %vm1850_vm10 = vcmp.ge.f32.partialorder %v1722_v0, 0.0  ;;  %v1978_v33 = vmul.f32 0.1, %v1722_v0  ;;  %v3807_v11 = vpop.f32.mrf.mxu0 }
 0x174   : > { %v3415_v53 = vpack.c.bf16 %v2042_v44, %v2041_v1  ;;  %vm1791_vm11 = vcmp.ge.f32.partialorder %v1663_v45, 0.0  ;;  %3636 = vst [vmem:[%s4338_s26 + $0xc8] sm:$0xff] %v3420_v26   ;;  %v1919_v7 = vmul.f32 0.1, %v1663_v45  ;;  %v1727_v35 = vadd.f32 %v4659_v10, %v1592_v27  ;;  %v3871_v18 = vpop.f32.mrf.mxu1 }
 0x175   : > { %3668 = vst [vmem:[%s4338_s26 + $0x1c8] sm:$0xff] %v3580_v29   ;;  %v1526_v36 = vmul.f32 %v4666_v46, %v4766_v19  ;;  %v1590_v43 = vmul.f32 %v4666_v46, %v4778_v54  ;;  %v2106_v8 = vsel %vm1850_vm10, %v1722_v0, %v1978_v33  ;;  %v1529_v14 = vmul.f32 %v4666_v46, %v4780_v9  ;;  %v1196_v38 = vpop.f32.mrf.mxu0 }
 0x176   : > { %3635 = vst [vmem:[%s4338_s26 + $0xc0] sm:$0xff] %v3415_v53   ;;  %v1593_v5 = vmul.f32 %v4666_v46, %v4786_v34  ;;  %v1527_v15 = vmul.f32 %v4666_v46, %v4788_v61  ;;  %v3575_v47 = vpack.c.bf16 %v2106_v8, %v2105_v6  ;;  %v2047_v57 = vsel %vm1791_vm11, %v1663_v45, %v1919_v7 }
 0x177   : > { %vm1855_vm12 = vcmp.ge.f32.partialorder %v1727_v35, 0.0  ;;  %v1983_v19 = vmul.f32 0.1, %v1727_v35  ;;  %v1661_v25 = vadd.f32 %v4659_v10, %v1526_v36  ;;  %v1725_v54 = vadd.f32 %v4659_v10, %v1590_v43  ;;  %v3808_v43 = vpop.f32.mrf.mxu0 }
 0x178   : > { %v1664_v48 = vadd.f32 %v4659_v10, %v1529_v14  ;;  %v1728_v59 = vadd.f32 %v4659_v10, %v1593_v5  ;;  %3667 = vst [vmem:[%s4338_s26 + $0x1c0] sm:$0xff] %v3575_v47   ;;  %v1662_v34 = vadd.f32 %v4659_v10, %v1527_v15  ;;  %v1591_v60 = vmul.f32 %v4666_v46, %v1423_v24 }
 0x179   : > { %v2111_v9 = vsel %vm1855_vm12, %v1727_v35, %v1983_v19  ;;  %v1532_v61 = vmul.f32 %v4666_v46, %v3803_v30  ;;  %vm1789_vm13 = vcmp.ge.f32.partialorder %v1661_v25, 0.0  ;;  %v1917_v42 = vmul.f32 0.1, %v1661_v25 }
 0x17a   : > { %vm1853_vm14 = vcmp.ge.f32.partialorder %v1725_v54, 0.0  ;;  %v1981_v21 = vmul.f32 0.1, %v1725_v54  ;;  %vm1792_vm15 = vcmp.ge.f32.partialorder %v1664_v48, 0.0  ;;  %v1920_v40 = vmul.f32 0.1, %v1664_v48 }
 0x17b   : > { %vm1856_vm0 = vcmp.ge.f32.partialorder %v1728_v59, 0.0  ;;  %v1984_v41 = vmul.f32 0.1, %v1728_v59  ;;  %v2045_v28 = vsel %vm1789_vm13, %v1661_v25, %v1917_v42  ;;  %vm1790_vm1 = vcmp.ge.f32.partialorder %v1662_v34, 0.0 }
 0x17c   : > { %v2109_v37 = vsel %vm1853_vm14, %v1725_v54, %v1981_v21  ;;  %v1918_v13 = vmul.f32 0.1, %v1662_v34  ;;  %v2048_v22 = vsel %vm1792_vm15, %v1664_v48, %v1920_v40  ;;  %v1726_v24 = vadd.f32 %v4659_v10, %v1591_v60 }
 0x17d   : > { %v2112_v51 = vsel %vm1856_vm0, %v1728_v59, %v1984_v41  ;;  %v1667_v20 = vadd.f32 %v4659_v10, %v1532_v61  ;;  %v3430_v49 = vpack.c.bf16 %v2048_v22, %v2047_v57  ;;  %v1596_v50 = vmul.f32 %v4666_v46, %v4814_v39 }
 0x17e   : > { %v3590_v31 = vpack.c.bf16 %v2112_v51, %v2111_v9  ;;  %v2046_v30 = vsel %vm1790_vm1, %v1662_v34, %v1918_v13  ;;  %vm1854_vm2 = vcmp.ge.f32.partialorder %v1726_v24, 0.0  ;;  %v1982_v23 = vmul.f32 0.1, %v1726_v24  ;;  %v1199_v9 = vpop.f32.mrf.mxu0 }
 0x17f   : > { %v3425_v58 = vpack.c.bf16 %v2046_v30, %v2045_v28  ;;  %vm1795_vm3 = vcmp.ge.f32.partialorder %v1667_v20, 0.0  ;;  %3638 = vst [vmem:[%s4338_s26 + $0xd8] sm:$0xff] %v3430_v49   ;;  %v1923_v16 = vmul.f32 0.1, %v1667_v20  ;;  %v1731_v17 = vadd.f32 %v4659_v10, %v1596_v50 }
 0x180   : > { %3670 = vst [vmem:[%s4338_s26 + $0x1d8] sm:$0xff] %v3590_v31   ;;  %v1530_v12 = vmul.f32 %v4666_v46, %v4816_v4  ;;  %v1594_v56 = vmul.f32 %v4666_v46, %v1436_v32  ;;  %v2110_v1 = vsel %vm1854_vm2, %v1726_v24, %v1982_v23  ;;  %v1533_v39 = vmul.f32 %v4666_v46, %v3804_v62  ;;  %v1452_v32 = vpop.f32.mrf.mxu1 }
 0x181   : > { %3637 = vst [vmem:[%s4338_s26 + $0xd0] sm:$0xff] %v3425_v58   ;;  %v1597_v6 = vmul.f32 %v4666_v46, %v3868_v63  ;;  %v1531_v3 = vmul.f32 %v4666_v46, %v1183_v55  ;;  %v3585_v52 = vpack.c.bf16 %v2110_v1, %v2109_v37  ;;  %vm1859_vm4 = vcmp.ge.f32.partialorder %v1731_v17, 0.0 }
 0x182   : > { %v1987_v0 = vmul.f32 0.1, %v1731_v17  ;;  %v1665_v45 = vadd.f32 %v4659_v10, %v1530_v12  ;;  %v1729_v4 = vadd.f32 %v4659_v10, %v1594_v56  ;;  %v1668_v26 = vadd.f32 %v4659_v10, %v1533_v39  ;;  %v3872_v25 = vpop.f32.mrf.mxu1 }
 0x183   : > { %v1732_v29 = vadd.f32 %v4659_v10, %v1597_v6  ;;  %3669 = vst [vmem:[%s4338_s26 + $0x1d0] sm:$0xff] %v3585_v52   ;;  %v2051_v44 = vsel %vm1795_vm3, %v1667_v20, %v1923_v16  ;;  %v1666_v27 = vadd.f32 %v4659_v10, %v1531_v3  ;;  %v1595_v53 = vmul.f32 %v4666_v46, %v1439_v2 }
 0x184   : > { %v1536_v33 = vmul.f32 %v4666_v46, %v3807_v11  ;;  %v2115_v7 = vsel %vm1859_vm4, %v1731_v17, %v1987_v0  ;;  %vm1793_vm5 = vcmp.ge.f32.partialorder %v1665_v45, 0.0  ;;  %v1921_v35 = vmul.f32 0.1, %v1665_v45  ;;  %v1455_v2 = vpop.f32.mrf.mxu1 }
 0x185   : > { %v1985_v36 = vmul.f32 0.1, %v1729_v4  ;;  %vm1796_vm6 = vcmp.ge.f32.partialorder %v1668_v26, 0.0  ;;  %v1924_v62 = vmul.f32 0.1, %v1668_v26  ;;  %vm1860_vm7 = vcmp.ge.f32.partialorder %v1732_v29, 0.0 }
 0x186   : > { %v1988_v8 = vmul.f32 0.1, %v1732_v29  ;;  %v2049_v14 = vsel %vm1793_vm5, %v1665_v45, %v1921_v35  ;;  %vm1857_vm8 = vcmp.ge.f32.partialorder %v1729_v4, 0.0  ;;  %vm1794_vm9 = vcmp.ge.f32.partialorder %v1666_v27, 0.0 }
 0x187   : > { %v1922_v5 = vmul.f32 0.1, %v1666_v27  ;;  %v2052_v15 = vsel %vm1796_vm6, %v1668_v26, %v1924_v62  ;;  %v1730_v57 = vadd.f32 %v4659_v10, %v1595_v53  ;;  %v1671_v19 = vadd.f32 %v4659_v10, %v1536_v33 }
 0x188   : > { %v2116_v47 = vsel %vm1860_vm7, %v1732_v29, %v1988_v8  ;;  %v3440_v54 = vpack.c.bf16 %v2052_v15, %v2051_v44  ;;  %v1600_v63 = vmul.f32 %v4666_v46, %v3871_v18  ;;  %v2113_v34 = vsel %vm1857_vm8, %v1729_v4, %v1985_v36 }
 0x189   : > { %v3600_v48 = vpack.c.bf16 %v2116_v47, %v2115_v7  ;;  %v2050_v59 = vsel %vm1794_vm9, %v1666_v27, %v1922_v5  ;;  %vm1858_vm10 = vcmp.ge.f32.partialorder %v1730_v57, 0.0  ;;  %v1986_v61 = vmul.f32 0.1, %v1730_v57 }
 0x18a   : > { %v3435_v60 = vpack.c.bf16 %v2050_v59, %v2049_v14  ;;  %3640 = vst [vmem:[%s4338_s26 + $0xe8] sm:$0xff] %v3440_v54   ;;  %v1927_v55 = vmul.f32 0.1, %v1671_v19  ;;  %v1735_v42 = vadd.f32 %v4659_v10, %v1600_v63  ;;  %v1534_v21 = vmul.f32 %v4666_v46, %v1196_v38 }
 0x18b   : > { %3672 = vst [vmem:[%s4338_s26 + $0x1e8] sm:$0xff] %v3600_v48   ;;  %v1598_v40 = vmul.f32 %v4666_v46, %v1452_v32  ;;  %v2114_v41 = vsel %vm1858_vm10, %v1730_v57, %v1986_v61  ;;  %v1537_v28 = vmul.f32 %v4666_v46, %v3808_v43  ;;  %v1601_v37 = vmul.f32 %v4666_v46, %v3872_v25 }
 0x18c   : > { %3639 = vst [vmem:[%s4338_s26 + $0xe0] sm:$0xff] %v3435_v60   ;;  %v1535_v13 = vmul.f32 %v4666_v46, %v1199_v9  ;;  %v3595_v22 = vpack.c.bf16 %v2114_v41, %v2113_v34  ;;  %vm1799_vm11 = vcmp.ge.f32.partialorder %v1671_v19, 0.0  ;;  %v1991_v51 = vmul.f32 0.1, %v1735_v42 }
 0x18d   : > { %v1669_v24 = vadd.f32 %v4659_v10, %v1534_v21  ;;  %v1733_v20 = vadd.f32 %v4659_v10, %v1598_v40  ;;  %v1672_v11 = vadd.f32 %v4659_v10, %v1537_v28  ;;  %v1736_v49 = vadd.f32 %v4659_v10, %v1601_v37 }
 0x18e   : > { %3671 = vst [vmem:[%s4338_s26 + $0x1e0] sm:$0xff] %v3595_v22   ;;  %vm1863_vm12 = vcmp.ge.f32.partialorder %v1735_v42, 0.0  ;;  %v1670_v31 = vadd.f32 %v4659_v10, %v1535_v13  ;;  %v1599_v30 = vmul.f32 %v4666_v46, %v1455_v2  ;;  %v2055_v50 = vsel %vm1799_vm11, %v1671_v19, %v1927_v55 }
 0x18f   : > { %vm1797_vm13 = vcmp.ge.f32.partialorder %v1669_v24, 0.0  ;;  %v1925_v58 = vmul.f32 0.1, %v1669_v24  ;;  %vm1800_vm14 = vcmp.ge.f32.partialorder %v1672_v11, 0.0  ;;  %v1928_v23 = vmul.f32 0.1, %v1672_v11 }
 0x190   : > { %vm1864_vm15 = vcmp.ge.f32.partialorder %v1736_v49, 0.0  ;;  %v1992_v16 = vmul.f32 0.1, %v1736_v49  ;;  %v2119_v17 = vsel %vm1863_vm12, %v1735_v42, %v1991_v51  ;;  %vm1861_vm0 = vcmp.ge.f32.partialorder %v1733_v20, 0.0 }
 0x191   : > { %vm1798_vm1 = vcmp.ge.f32.partialorder %v1670_v31, 0.0  ;;  %v1926_v12 = vmul.f32 0.1, %v1670_v31  ;;  %v1989_v56 = vmul.f32 0.1, %v1733_v20  ;;  %v2056_v18 = vsel %vm1800_vm14, %v1672_v11, %v1928_v23 }
 0x192   : > { %v2120_v1 = vsel %vm1864_vm15, %v1736_v49, %v1992_v16  ;;  %v1734_v46 = vadd.f32 %v4659_v10, %v1599_v30  ;;  %v2053_v39 = vsel %vm1797_vm13, %v1669_v24, %v1925_v58  ;;  %v3450_v6 = vpack.c.bf16 %v2056_v18, %v2055_v50 }
 0x193   : > { %v3610_v3 = vpack.c.bf16 %v2120_v1, %v2119_v17  ;;  %v2054_v38 = vsel %vm1798_vm1, %v1670_v31, %v1926_v12  ;;  %v2117_v45 = vsel %vm1861_vm0, %v1733_v20, %v1989_v56 }
 0x194   : > { %v3445_v52 = vpack.c.bf16 %v2054_v38, %v2053_v39  ;;  %vm1862_vm2 = vcmp.ge.f32.partialorder %v1734_v46, 0.0  ;;  %v1990_v0 = vmul.f32 0.1, %v1734_v46  ;;  %3642 = vst [vmem:[%s4338_s26 + $0xf8] sm:$0xff] %v3450_v6  }
 0x195   : > { %3674 = vst [vmem:[%s4338_s26 + $0x1f8] sm:$0xff] %v3610_v3  }
 0x196   : > { %3641 = vst [vmem:[%s4338_s26 + $0xf0] sm:$0xff] %v3445_v52   ;;  %v2118_v4 = vsel %vm1862_vm2, %v1734_v46, %v1990_v0 }
 0x197   : > { %v3605_v10 = vpack.c.bf16 %v2118_v4, %v2117_v45 }
 0x199   : > { %3673 = vst [vmem:[%s4338_s26 + $0x1f0] sm:$0xff] %v3605_v10  }
 0x19a   : > { %4016 = shalt.err (!%p4013_p5)
}
 0x19b   : > { %s4017_s22 = scalar_lea.hbm %s4896_s11, 8192  ;;  %s4021_s29 = scalar_lea.hbm %s4952_s4, 65536 }
 0x19c   : > { %p4018_p6 = scmp.ne.s32.totalorder %s4896_s11, %s4017_s22  ;;  %p4022_p10 = scmp.lt.s32.totalorder %s4896_s11, %s4952_s4 }
 0x19d   : > { %p4023_p11 = scmp.lt.s32.totalorder %s4021_s29, %s4017_s22 }
 0x19e   : > { %p4019_p7 = pnand %p4018_p6, %p4150_p4 }
 0x19f   : > { %p4024_p12 = por %p4023_p11, %p4022_p10 }
 0x1a0   : > { %p4020_p9 = pneg %p4019_p7 }
 0x1a2   : > { %p4025_p13 = pnand %p4024_p12, %p4020_p9 }
 0x1a4   : > { %4028 = shalt.err (!%p4025_p13)
}
 0x1a5   : > { %s4083_s6 = smov 64   ;;  %s4084_s7 = smov 4  }
 0x1a6   : > { %3877 = dma.vmem_to_hbm [thread:$0]  (%p4150_p4), %s4898_s8, 8192, %s4896_s11, %s4903_s18, %s4083_s6, %s4083_s6, %s4084_s7  }
 0x1a7 PF: > { %p3883_p0 = scmp.ge.s32.totalorder %s4079_s20, 2  ;;  %s2791_s9 = sand.u32 1, %s4059_s15  }
 0x1a8   : > { %s2792_s10 = scalar_lea.sflag [#allocation3], %s2791_s9 }
 0x1a9   : > { %p3880_p1 = pnand %p3883_p0, %p4157_p8 }
 0x1ab   : > { %p3881_p2 = pneg %p3880_p1 }
 0x1ad   : > { %4054 = dma.done.wait (%p3881_p2), %s2792_s10, 8192  }
 0x1ae   : > { %4056 = vsyncadd (%p3881_p2), %s2792_s10, 4294959104  ;;  %s17_s20 = sadd.s32 1, %s4079_s20   ;;  %s4955_s15 = smov %s4063_s16 }
 0x1af   : > { %p14_p3 = scmp.ge.s32.totalorder %s17_s20, 10   ;;  %s4956_s16 = smov %s4067_s17 }
 0x1b0   : > { %s4957_s17 = smov %s4163_s28  ;;  %s4958_s18 = smov %s4075_s19 }
 0x1b1   : > { %s4959_s19 = smov %s4961_s23  ;;  %16 = sbr.rel (!%p14_p3) target bundleno = 4 (0x4), region = 80 }
 0x1b6   :  { %2797 = vsyncpa [#allocation3], 1 }
 0x1b7   :  { %2799 = vsyncpa [#allocation3 + $0x1], 1 }

</bundles_post_ra>
